<compile_context>
chip_gen: v7x
topology: tpu7x:2x2x1
jax: 0.10.0
libtpu: 0.0.40
codegen_flags: <defaults>
</compile_context>

<pallas_src>
import functools
import math

import jax
import jax.numpy as jnp
import numpy as np
from jax import lax
from jax.experimental import pallas as pl
from jax.experimental.pallas import tpu as pltpu

# Large finite negative instead of -inf: exp(mask - m) underflows to exactly 0,
# and max()/exp() never see inf-inf (NaN) even on partially masked rows.
_MASK_VALUE = -0.7 * float(np.finfo(np.float32).max)


def _mha_flash_kernel(xq_ref, xkv_ref, wq_ref, wkv_ref, wo_ref, bo_ref,   # in
                      o_ref,                                              # out
                      q_scr, m_scr, l_scr, acc_scr,                       # scratch
                      *, num_heads, head_dim, block_q, block_kv, scale):
    # xq_ref : (1, tq, d_in)     query-tile activations
    # xkv_ref: (1, tkv, d_in)    kv-tile activations (same array, different tiling)
    # wq_ref : (d_in, d_out)     resident
    # wkv_ref: (d_in, 2*d_out)   resident, packed [W_k | W_v]
    # wo_ref : (d_out, d_out)    resident
    # bo_ref : (1, d_out)        resident
    # o_ref  : (1, tq, d_out)    output tile (same block across kv axis)
    # q_scr  : (tq, d_out)       pre-scaled queries, input dtype
    # m_scr  : (H, tq, 1) f32    running row max  (per head)
    # l_scr  : (H, tq, 1) f32    running row sum  (per head)
    # acc_scr: (tq, d_out) f32   un-normalized context, heads lane-concatenated
    qi = pl.program_id(1)
    ki = pl.program_id(2)
    H, hd = num_heads, head_dim
    d_out = H * hd
    cdt = xq_ref.dtype            # MXU-operand dtype (bf16 in production)

    q_start = qi * block_q
    kv_start = ki * block_kv

    # ---- per-(batch, q-tile) init: project queries once, reset softmax state.
    @pl.when(ki == 0)
    def _init():
        q = jnp.dot(xq_ref[0], wq_ref[...],
                    preferred_element_type=jnp.float32) * jnp.float32(scale)
        q_scr[...] = q.astype(cdt)
        m_scr[...] = jnp.full_like(m_scr, -jnp.inf)
        l_scr[...] = jnp.zeros_like(l_scr)
        acc_scr[...] = jnp.zeros_like(acc_scr)

    visible = kv_start < q_start + block_q            # tile not entirely in the future
    on_diag = kv_start + block_kv - 1 > q_start       # tile straddles the causal diagonal

    def _update(apply_mask):
        # Fused K|V projection for this kv tile: one wide MXU matmul.
        kv = jnp.dot(xkv_ref[0], wkv_ref[...],
                     preferred_element_type=jnp.float32)        # (tkv, 2*d_out) f32
        k = kv[:, :d_out].astype(cdt)
        v = kv[:, d_out:].astype(cdt)

        if apply_mask:
            rows = lax.broadcasted_iota(jnp.int32, (block_q, block_kv), 0) + q_start
            cols = lax.broadcasted_iota(jnp.int32, (block_q, block_kv), 1) + kv_start
            future = cols > rows

        # Static per-head loop; all carried state lives in VMEM scratch slices,
        # so the live register set stays bounded to a single head.
        for h in range(H):
            sl = slice(h * hd, (h + 1) * hd)
            q_h = q_scr[:, sl]                                   # (tq, hd), pre-scaled
            # Scores: contract last dims directly (no explicit k transpose).
            s = lax.dot_general(q_h, k[:, sl], (((1,), (1,)), ((), ())),
                                preferred_element_type=jnp.float32)   # (tq, tkv)
            if apply_mask:
                s = jnp.where(future, _MASK_VALUE, s)

            m_prev = m_scr[h]                                    # (tq, 1)
            m_new = jnp.maximum(m_prev, jnp.max(s, axis=-1, keepdims=True))
            alpha = jnp.exp(m_prev - m_new)
            p = jnp.exp(s - m_new)
            l_scr[h] = alpha * l_scr[h] + jnp.sum(p, axis=-1, keepdims=True)
            acc_scr[:, sl] = alpha * acc_scr[:, sl] + jnp.dot(
                p.astype(cdt), v[:, sl], preferred_element_type=jnp.float32)
            m_scr[h] = m_new

    @pl.when(jnp.logical_and(visible, on_diag))
    def _masked_tile():
        _update(apply_mask=True)

    @pl.when(jnp.logical_and(visible, jnp.logical_not(on_diag)))
    def _visible_tile():
        _update(apply_mask=False)       # fully below the diagonal: no mask filler

    # ---- finalize: normalize per head, single full-width output projection.
    @pl.when(ki == pl.num_programs(2) - 1)
    def _finalize():
        for h in range(H):
            sl = slice(h * hd, (h + 1) * hd)
            acc_scr[:, sl] = acc_scr[:, sl] * pl.reciprocal(l_scr[h], approx=True)
        ctx = acc_scr[...].astype(cdt)                           # (tq, d_out)
        out = jnp.dot(ctx, wo_ref[...],
                      preferred_element_type=jnp.float32) + bo_ref[...]
        o_ref[0] = out.astype(o_ref.dtype)


def _vmem_limit_bytes():
    # Raise the scoped-VMEM limit for deep pipelining on v5e/v6e (128 MiB
    # physical) while leaving ~8 MiB headroom on v7x (64 MiB per TC).
    try:
        cap = int(pltpu.get_tpu_info().vmem_capacity_bytes)
        return max(32 * 1024 * 1024, min(100 * 1024 * 1024, cap - 8 * 1024 * 1024))
    except Exception:
        return 64 * 1024 * 1024


def pack_mha_weights(wq, wk, wv, wo, bo):
    """One-time weight packing (hoisted out of the per-call forward path)."""
    return wq, jnp.concatenate([wk, wv], axis=1), wo, bo.reshape(1, -1)


@functools.partial(jax.jit, static_argnames=("num_heads", "block_q", "block_kv"))
def multi_head_attention(x, wq, w_kv, wo, bo2, *, num_heads,
                         block_q=256, block_kv=512):
    """x: (B, T, d_in); wq: (d_in, d_out); w_kv: (d_in, 2*d_out) = [W_k|W_v];
    wo: (d_out, d_out); bo2: (1, d_out). Linear convention: y = x @ W (+ b)."""
    B, T, d_in = x.shape
    d_out = wq.shape[1]
    assert d_out % num_heads == 0, "d_out must be divisible by num_heads"
    hd = d_out // num_heads

    tq = min(block_q, T)
    tkv = min(block_kv, T)
    assert T % tq == 0 and T % tkv == 0, "T must be divisible by the tile sizes"
    num_q, num_kv = T // tq, T // tkv

    kernel = functools.partial(
        _mha_flash_kernel, num_heads=num_heads, head_dim=hd,
        block_q=tq, block_kv=tkv, scale=1.0 / math.sqrt(hd))

    return pl.pallas_call(
        kernel,
        out_shape=jax.ShapeDtypeStruct((B, T, d_out), x.dtype),
        grid_spec=pltpu.PrefetchScalarGridSpec(
            num_scalar_prefetch=0,
            grid=(B, num_q, num_kv),                       # kv reduction innermost
            in_specs=[
                pl.BlockSpec((1, tq, d_in), lambda b, qi, ki: (b, qi, 0)),   # x (q tile)
                pl.BlockSpec((1, tkv, d_in), lambda b, qi, ki: (b, ki, 0)),  # x (kv tile)
                # Weights / bias are grid-resident (constant block index -> one DMA).
                pl.BlockSpec((d_in, d_out), lambda b, qi, ki: (0, 0)),       # W_q
                pl.BlockSpec((d_in, 2 * d_out), lambda b, qi, ki: (0, 0)),   # [W_k|W_v]
                pl.BlockSpec((d_out, d_out), lambda b, qi, ki: (0, 0)),      # W_o
                pl.BlockSpec((1, d_out), lambda b, qi, ki: (0, 0)),          # b_o
            ],
            out_specs=pl.BlockSpec((1, tq, d_out), lambda b, qi, ki: (b, qi, 0)),
            scratch_shapes=[
                pltpu.VMEM((tq, d_out), x.dtype),               # pre-scaled q
                pltpu.VMEM((num_heads, tq, 1), jnp.float32),    # running max
                pltpu.VMEM((num_heads, tq, 1), jnp.float32),    # running sum
                pltpu.VMEM((tq, d_out), jnp.float32),           # context accumulator
            ],
        ),
        compiler_params=pltpu.CompilerParams(
            dimension_semantics=("parallel", "parallel", "arbitrary"),
            vmem_limit_bytes=_vmem_limit_bytes(),
        ),
    )(x, x, wq, w_kv, wo, bo2)


def _reference(x, wq, wk, wv, wo, bo, *, num_heads):
    # Pure-JAX reference mirroring the PyTorch forward.
    B, T, d_in = x.shape
    d_out = wq.shape[1]
    hd = d_out // num_heads
    q = (x @ wq).reshape(B, T, num_heads, hd).transpose(0, 2, 1, 3)
    k = (x @ wk).reshape(B, T, num_heads, hd).transpose(0, 2, 1, 3)
    v = (x @ wv).reshape(B, T, num_heads, hd).transpose(0, 2, 1, 3)
    s = jnp.einsum("bhqd,bhkd->bhqk", q, k)
    mask = jnp.triu(jnp.ones((T, T), bool), k=1)
    s = jnp.where(mask, -jnp.inf, s)
    w = jax.nn.softmax(s / math.sqrt(hd), axis=-1)
    ctx = jnp.einsum("bhqk,bhkd->bhqd", w, v).transpose(0, 2, 1, 3).reshape(B, T, d_out)
    return ctx @ wo + bo


if __name__ == "__main__":
    # module config: d_in=16, d_out=32, context_length=8, dropout=0.0, num_heads=4
    B, T, d_in, d_out, num_heads = 2, 8, 16, 32, 4

    key = jax.random.PRNGKey(0)
    kx, kq, kk, kv, ko, kb = jax.random.split(key, 6)

    x = jax.random.normal(kx, (B, T, d_in), jnp.float32)
    # Linear weights stored as (in_features, out_features): y = x @ W (+ b).
    wq = jax.random.normal(kq, (d_in, d_out), jnp.float32) * 0.1
    wk = jax.random.normal(kk, (d_in, d_out), jnp.float32) * 0.1
    wv = jax.random.normal(kv, (d_in, d_out), jnp.float32) * 0.1
    wo = jax.random.normal(ko, (d_out, d_out), jnp.float32) * 0.1
    bo = jax.random.normal(kb, (d_out,), jnp.float32) * 0.1

    # Pack once at init (hoisted out of the forward path), then run the kernel.
    wq_p, wkv_p, wo_p, bo_p = pack_mha_weights(wq, wk, wv, wo, bo)
    out = multi_head_attention(x, wq_p, wkv_p, wo_p, bo_p, num_heads=num_heads)
    out = jax.block_until_ready(out)

    ref = _reference(x, wq, wk, wv, wo, bo, num_heads=num_heads)
    # Tolerance loosened vs f32-exact because the softmax denominator uses the
    # EUP approximate reciprocal (per-row uniform scale error, well below 1e-2).
    np.testing.assert_allclose(np.asarray(out), np.asarray(ref), rtol=2e-2, atol=1e-2)

    print("KERNEL_OK")
</pallas_src>

<mosaic_0001>
module attributes {stable_mosaic.version = 11 : i64} {
  func.func @_mha_flash_kernel(%arg0: i32, %arg1: i32, %arg2: i32, %arg3: memref<1x8x16xf32, #tpu.memory_space<vmem>>, %arg4: memref<1x8x16xf32, #tpu.memory_space<vmem>>, %arg5: memref<16x32xf32, #tpu.memory_space<vmem>>, %arg6: memref<16x64xf32, #tpu.memory_space<vmem>>, %arg7: memref<32x32xf32, #tpu.memory_space<vmem>>, %arg8: memref<1x32xf32, #tpu.memory_space<vmem>>, %arg9: memref<1x8x32xf32, #tpu.memory_space<vmem>>, %arg10: memref<8x32xf32, #tpu.memory_space<vmem>>, %arg11: memref<4x8x1xf32, #tpu.memory_space<vmem>>, %arg12: memref<4x8x1xf32, #tpu.memory_space<vmem>>, %arg13: memref<8x32xf32, #tpu.memory_space<vmem>>) attributes {dimension_semantics = [#tpu.dimension_semantics<parallel>, #tpu.dimension_semantics<parallel>, #tpu.dimension_semantics<arbitrary>], iteration_bounds = array<i64: 2, 1, 1>, scalar_prefetch = 0 : i64, scratch_operands = 4 : i64, tpu.core_type = #tpu.core_type<tc>, window_params = [{transform_indices = @transform_0, window_bounds = array<i64: 1, 8, 16>}, {transform_indices = @transform_1, window_bounds = array<i64: 1, 8, 16>}, {pipeline_mode = #tpu.pipeline_mode<synchronous>, transform_indices = @transform_2, window_bounds = array<i64: 16, 32>}, {pipeline_mode = #tpu.pipeline_mode<synchronous>, transform_indices = @transform_3, window_bounds = array<i64: 16, 64>}, {pipeline_mode = #tpu.pipeline_mode<synchronous>, transform_indices = @transform_4, window_bounds = array<i64: 32, 32>}, {pipeline_mode = #tpu.pipeline_mode<synchronous>, transform_indices = @transform_5, window_bounds = array<i64: 1, 32>}, {transform_indices = @transform_6, window_bounds = array<i64: 1, 8, 32>}]} {
    %c8_i32 = arith.constant 8 : i32
    %0 = arith.muli %arg1, %c8_i32 : i32
    %c8_i32_0 = arith.constant 8 : i32
    %1 = arith.muli %arg2, %c8_i32_0 : i32
    %c0_i32 = arith.constant 0 : i32
    %2 = arith.cmpi eq, %arg2, %c0_i32 : i32
    %3 = arith.extui %2 : i1 to i32
    %c0_i32_1 = arith.constant 0 : i32
    %4 = arith.cmpi ne, %3, %c0_i32_1 : i32
    scf.if %4 {
      %c0 = arith.constant 0 : index
      %c0_8 = arith.constant 0 : index
      %c0_9 = arith.constant 0 : index
      %20 = vector.load %arg3[%c0, %c0_8, %c0_9] : memref<1x8x16xf32, #tpu.memory_space<vmem>>, vector<1x8x16xf32>
      %21 = vector.shape_cast %20 : vector<1x8x16xf32> to vector<8x16xf32>
      %c0_10 = arith.constant 0 : index
      %c0_11 = arith.constant 0 : index
      %22 = vector.load %arg5[%c0_10, %c0_11] : memref<16x32xf32, #tpu.memory_space<vmem>>, vector<16x32xf32>
      %cst = arith.constant dense<0.000000e+00> : vector<8x32xf32>
      %23 = tpu.matmul %21, %22, %cst {dimension_numbers = #tpu.dot_dimension_numbers<[1], [0], [0], [1], [0, 0, 1, 1], [], []>} : vector<8x16xf32>, vector<16x32xf32>, vector<8x32xf32> -> vector<8x32xf32>
      %cst_12 = arith.constant 0.353553385 : f32
      %24 = vector.broadcast %cst_12 : f32 to vector<8x32xf32>
      %25 = arith.mulf %23, %24 : vector<8x32xf32>
      %c0_13 = arith.constant 0 : index
      %c0_14 = arith.constant 0 : index
      %26 = vector.load %arg10[%c0_13, %c0_14] : memref<8x32xf32, #tpu.memory_space<vmem>>, vector<8x32xf32>
      tpu.vector_store %arg10[%c0_13, %c0_14], %25 {strides = array<i32>} : memref<8x32xf32, #tpu.memory_space<vmem>>, vector<8x32xf32>,
      %cst_15 = arith.constant 0xFF800000 : f32
      %27 = vector.broadcast %cst_15 : f32 to vector<4x8x1xf32>
      %c0_16 = arith.constant 0 : index
      %c0_17 = arith.constant 0 : index
      %c0_18 = arith.constant 0 : index
      %28 = vector.load %arg11[%c0_16, %c0_17, %c0_18] : memref<4x8x1xf32, #tpu.memory_space<vmem>>, vector<4x8x1xf32>
      tpu.vector_store %arg11[%c0_16, %c0_17, %c0_18], %27 {strides = array<i32>} : memref<4x8x1xf32, #tpu.memory_space<vmem>>, vector<4x8x1xf32>,
      %cst_19 = arith.constant 0.000000e+00 : f32
      %29 = vector.broadcast %cst_19 : f32 to vector<4x8x1xf32>
      %c0_20 = arith.constant 0 : index
      %c0_21 = arith.constant 0 : index
      %c0_22 = arith.constant 0 : index
      %30 = vector.load %arg12[%c0_20, %c0_21, %c0_22] : memref<4x8x1xf32, #tpu.memory_space<vmem>>, vector<4x8x1xf32>
      tpu.vector_store %arg12[%c0_20, %c0_21, %c0_22], %29 {strides = array<i32>} : memref<4x8x1xf32, #tpu.memory_space<vmem>>, vector<4x8x1xf32>,
      %cst_23 = arith.constant 0.000000e+00 : f32
      %31 = vector.broadcast %cst_23 : f32 to vector<8x32xf32>
      %c0_24 = arith.constant 0 : index
      %c0_25 = arith.constant 0 : index
      %32 = vector.load %arg13[%c0_24, %c0_25] : memref<8x32xf32, #tpu.memory_space<vmem>>, vector<8x32xf32>
      tpu.vector_store %arg13[%c0_24, %c0_25], %31 {strides = array<i32>} : memref<8x32xf32, #tpu.memory_space<vmem>>, vector<8x32xf32>,
    } else {
    }
    %c8_i32_2 = arith.constant 8 : i32
    %5 = arith.addi %0, %c8_i32_2 : i32
    %6 = arith.cmpi slt, %1, %5 : i32
    %c8_i32_3 = arith.constant 8 : i32
    %7 = arith.addi %1, %c8_i32_3 : i32
    %c1_i32 = arith.constant 1 : i32
    %8 = arith.subi %7, %c1_i32 : i32
    %9 = arith.cmpi sgt, %8, %0 : i32
    %10 = arith.andi %6, %9 : i1
    %11 = arith.extui %10 : i1 to i32
    %c0_i32_4 = arith.constant 0 : i32
    %12 = arith.cmpi ne, %11, %c0_i32_4 : i32
    scf.if %12 {
      %c0 = arith.constant 0 : index
      %c0_8 = arith.constant 0 : index
      %c0_9 = arith.constant 0 : index
      %20 = vector.load %arg4[%c0, %c0_8, %c0_9] : memref<1x8x16xf32, #tpu.memory_space<vmem>>, vector<1x8x16xf32>
      %21 = vector.shape_cast %20 : vector<1x8x16xf32> to vector<8x16xf32>
      %c0_10 = arith.constant 0 : index
      %c0_11 = arith.constant 0 : index
      %22 = vector.load %arg6[%c0_10, %c0_11] : memref<16x64xf32, #tpu.memory_space<vmem>>, vector<16x64xf32>
      %cst = arith.constant dense<0.000000e+00> : vector<8x64xf32>
      %23 = tpu.matmul %21, %22, %cst {dimension_numbers = #tpu.dot_dimension_numbers<[1], [0], [0], [1], [0, 0, 1, 1], [], []>} : vector<8x16xf32>, vector<16x64xf32>, vector<8x64xf32> -> vector<8x64xf32>
      %24 = vector.extract_strided_slice %23 {offsets = [0, 0], sizes = [8, 32], strides = [1, 1]} : vector<8x64xf32> to vector<8x32xf32>
      %25 = vector.extract_strided_slice %23 {offsets = [0, 32], sizes = [8, 32], strides = [1, 1]} : vector<8x64xf32> to vector<8x32xf32>
      %26 = tpu.iota {dimensions = array<i32: 0>} : vector<8x8xi32>
      %27 = vector.broadcast %0 : i32 to vector<8x8xi32>
      %28 = arith.addi %26, %27 : vector<8x8xi32>
      %29 = tpu.iota {dimensions = array<i32: 1>} : vector<8x8xi32>
      %30 = vector.broadcast %1 : i32 to vector<8x8xi32>
      %31 = arith.addi %29, %30 : vector<8x8xi32>
      %32 = arith.cmpi sgt, %31, %28 : vector<8x8xi32>
      %c0_12 = arith.constant 0 : index
      %c0_13 = arith.constant 0 : index
      %33 = vector.load %arg10[%c0_12, %c0_13] : memref<8x32xf32, #tpu.memory_space<vmem>>, vector<8x8xf32>
      %34 = vector.extract_strided_slice %24 {offsets = [0, 0], sizes = [8, 8], strides = [1, 1]} : vector<8x32xf32> to vector<8x8xf32>
      %cst_14 = arith.constant dense<0.000000e+00> : vector<8x8xf32>
      %35 = tpu.matmul %33, %34, %cst_14 {dimension_numbers = #tpu.dot_dimension_numbers<[1], [1], [0], [0], [0, 0, 1, 0], [], []>} : vector<8x8xf32>, vector<8x8xf32>, vector<8x8xf32> -> vector<8x8xf32>
      %cst_15 = arith.constant -2.38197633E+38 : f32
      %36 = vector.broadcast %cst_15 : f32 to vector<8x8xf32>
      %37 = arith.select %32, %36, %35 : vector<8x8xi1>, vector<8x8xf32>
      %c0_16 = arith.constant 0 : index
      %c0_17 = arith.constant 0 : index
      %c0_18 = arith.constant 0 : index
      %38 = vector.load %arg11[%c0_16, %c0_17, %c0_18] : memref<4x8x1xf32, #tpu.memory_space<vmem>>, vector<1x8x1xf32>
      %39 = vector.shape_cast %38 : vector<1x8x1xf32> to vector<8x1xf32>
      %cst_19 = arith.constant dense<0xFF800000> : vector<8xf32>
      %40 = vector.multi_reduction <maximumf>, %37, %cst_19 [1] : vector<8x8xf32> to vector<8xf32>
      %41 = vector.shape_cast %40 : vector<8xf32> to vector<8x1xf32>
      %42 = arith.maximumf %39, %41 : vector<8x1xf32>
      %43 = arith.subf %39, %42 : vector<8x1xf32>
      %44 = math.exp %43 : vector<8x1xf32>
      %45 = vector.broadcast %42 : vector<8x1xf32> to vector<8x8xf32>
      %46 = arith.subf %37, %45 : vector<8x8xf32>
      %47 = math.exp %46 : vector<8x8xf32>
      %c0_20 = arith.constant 0 : index
      %c0_21 = arith.constant 0 : index
      %c0_22 = arith.constant 0 : index
      %48 = vector.load %arg12[%c0_20, %c0_21, %c0_22] : memref<4x8x1xf32, #tpu.memory_space<vmem>>, vector<1x8x1xf32>
      %49 = vector.shape_cast %48 : vector<1x8x1xf32> to vector<8x1xf32>
      %50 = arith.mulf %44, %49 : vector<8x1xf32>
      %cst_23 = arith.constant dense<0.000000e+00> : vector<8xf32>
      %51 = vector.multi_reduction <add>, %47, %cst_23 [1] : vector<8x8xf32> to vector<8xf32>
      %52 = vector.shape_cast %51 : vector<8xf32> to vector<8x1xf32>
      %53 = arith.addf %50, %52 : vector<8x1xf32>
      %c0_24 = arith.constant 0 : index
      %c0_25 = arith.constant 0 : index
      %c0_26 = arith.constant 0 : index
      %54 = vector.load %arg12[%c0_24, %c0_25, %c0_26] : memref<4x8x1xf32, #tpu.memory_space<vmem>>, vector<1x8x1xf32>
      %55 = vector.shape_cast %54 : vector<1x8x1xf32> to vector<8x1xf32>
      %56 = vector.shape_cast %53 : vector<8x1xf32> to vector<1x8x1xf32>
      tpu.vector_store %arg12[%c0_24, %c0_25, %c0_26], %56 {strides = array<i32>} : memref<4x8x1xf32, #tpu.memory_space<vmem>>, vector<1x8x1xf32>,
      %c0_27 = arith.constant 0 : index
      %c0_28 = arith.constant 0 : index
      %57 = vector.load %arg13[%c0_27, %c0_28] : memref<8x32xf32, #tpu.memory_space<vmem>>, vector<8x8xf32>
      %58 = vector.broadcast %44 : vector<8x1xf32> to vector<8x8xf32>
      %59 = arith.mulf %58, %57 : vector<8x8xf32>
      %60 = vector.extract_strided_slice %25 {offsets = [0, 0], sizes = [8, 8], strides = [1, 1]} : vector<8x32xf32> to vector<8x8xf32>
      %cst_29 = arith.constant dense<0.000000e+00> : vector<8x8xf32>
      %61 = tpu.matmul %47, %60, %cst_29 {dimension_numbers = #tpu.dot_dimension_numbers<[1], [0], [0], [1], [0, 0, 1, 1], [], []>} : vector<8x8xf32>, vector<8x8xf32>, vector<8x8xf32> -> vector<8x8xf32>
      %62 = arith.addf %59, %61 : vector<8x8xf32>
      %c0_30 = arith.constant 0 : index
      %c0_31 = arith.constant 0 : index
      %63 = vector.load %arg13[%c0_30, %c0_31] : memref<8x32xf32, #tpu.memory_space<vmem>>, vector<8x8xf32>
      tpu.vector_store %arg13[%c0_30, %c0_31], %62 {strides = array<i32>} : memref<8x32xf32, #tpu.memory_space<vmem>>, vector<8x8xf32>,
      %c0_32 = arith.constant 0 : index
      %c0_33 = arith.constant 0 : index
      %c0_34 = arith.constant 0 : index
      %64 = vector.load %arg11[%c0_32, %c0_33, %c0_34] : memref<4x8x1xf32, #tpu.memory_space<vmem>>, vector<1x8x1xf32>
      %65 = vector.shape_cast %64 : vector<1x8x1xf32> to vector<8x1xf32>
      %66 = vector.shape_cast %42 : vector<8x1xf32> to vector<1x8x1xf32>
      tpu.vector_store %arg11[%c0_32, %c0_33, %c0_34], %66 {strides = array<i32>} : memref<4x8x1xf32, #tpu.memory_space<vmem>>, vector<1x8x1xf32>,
      %c0_35 = arith.constant 0 : index
      %c8 = arith.constant 8 : index
      %67 = vector.load %arg10[%c0_35, %c8] : memref<8x32xf32, #tpu.memory_space<vmem>>, vector<8x8xf32>
      %68 = vector.extract_strided_slice %24 {offsets = [0, 8], sizes = [8, 8], strides = [1, 1]} : vector<8x32xf32> to vector<8x8xf32>
      %cst_36 = arith.constant dense<0.000000e+00> : vector<8x8xf32>
      %69 = tpu.matmul %67, %68, %cst_36 {dimension_numbers = #tpu.dot_dimension_numbers<[1], [1], [0], [0], [0, 0, 1, 0], [], []>} : vector<8x8xf32>, vector<8x8xf32>, vector<8x8xf32> -> vector<8x8xf32>
      %cst_37 = arith.constant -2.38197633E+38 : f32
      %70 = vector.broadcast %cst_37 : f32 to vector<8x8xf32>
      %71 = arith.select %32, %70, %69 : vector<8x8xi1>, vector<8x8xf32>
      %c1 = arith.constant 1 : index
      %c0_38 = arith.constant 0 : index
      %c0_39 = arith.constant 0 : index
      %72 = vector.load %arg11[%c1, %c0_38, %c0_39] : memref<4x8x1xf32, #tpu.memory_space<vmem>>, vector<1x8x1xf32>
      %73 = vector.shape_cast %72 : vector<1x8x1xf32> to vector<8x1xf32>
      %cst_40 = arith.constant dense<0xFF800000> : vector<8xf32>
      %74 = vector.multi_reduction <maximumf>, %71, %cst_40 [1] : vector<8x8xf32> to vector<8xf32>
      %75 = vector.shape_cast %74 : vector<8xf32> to vector<8x1xf32>
      %76 = arith.maximumf %73, %75 : vector<8x1xf32>
      %77 = arith.subf %73, %76 : vector<8x1xf32>
      %78 = math.exp %77 : vector<8x1xf32>
      %79 = vector.broadcast %76 : vector<8x1xf32> to vector<8x8xf32>
      %80 = arith.subf %71, %79 : vector<8x8xf32>
      %81 = math.exp %80 : vector<8x8xf32>
      %c1_41 = arith.constant 1 : index
      %c0_42 = arith.constant 0 : index
      %c0_43 = arith.constant 0 : index
      %82 = vector.load %arg12[%c1_41, %c0_42, %c0_43] : memref<4x8x1xf32, #tpu.memory_space<vmem>>, vector<1x8x1xf32>
      %83 = vector.shape_cast %82 : vector<1x8x1xf32> to vector<8x1xf32>
      %84 = arith.mulf %78, %83 : vector<8x1xf32>
      %cst_44 = arith.constant dense<0.000000e+00> : vector<8xf32>
      %85 = vector.multi_reduction <add>, %81, %cst_44 [1] : vector<8x8xf32> to vector<8xf32>
      %86 = vector.shape_cast %85 : vector<8xf32> to vector<8x1xf32>
      %87 = arith.addf %84, %86 : vector<8x1xf32>
      %c1_45 = arith.constant 1 : index
      %c0_46 = arith.constant 0 : index
      %c0_47 = arith.constant 0 : index
      %88 = vector.load %arg12[%c1_45, %c0_46, %c0_47] : memref<4x8x1xf32, #tpu.memory_space<vmem>>, vector<1x8x1xf32>
      %89 = vector.shape_cast %88 : vector<1x8x1xf32> to vector<8x1xf32>
      %90 = vector.shape_cast %87 : vector<8x1xf32> to vector<1x8x1xf32>
      tpu.vector_store %arg12[%c1_45, %c0_46, %c0_47], %90 {strides = array<i32>} : memref<4x8x1xf32, #tpu.memory_space<vmem>>, vector<1x8x1xf32>,
      %c0_48 = arith.constant 0 : index
      %c8_49 = arith.constant 8 : index
      %91 = vector.load %arg13[%c0_48, %c8_49] : memref<8x32xf32, #tpu.memory_space<vmem>>, vector<8x8xf32>
      %92 = vector.broadcast %78 : vector<8x1xf32> to vector<8x8xf32>
      %93 = arith.mulf %92, %91 : vector<8x8xf32>
      %94 = vector.extract_strided_slice %25 {offsets = [0, 8], sizes = [8, 8], strides = [1, 1]} : vector<8x32xf32> to vector<8x8xf32>
      %cst_50 = arith.constant dense<0.000000e+00> : vector<8x8xf32>
      %95 = tpu.matmul %81, %94, %cst_50 {dimension_numbers = #tpu.dot_dimension_numbers<[1], [0], [0], [1], [0, 0, 1, 1], [], []>} : vector<8x8xf32>, vector<8x8xf32>, vector<8x8xf32> -> vector<8x8xf32>
      %96 = arith.addf %93, %95 : vector<8x8xf32>
      %c0_51 = arith.constant 0 : index
      %c8_52 = arith.constant 8 : index
      %97 = vector.load %arg13[%c0_51, %c8_52] : memref<8x32xf32, #tpu.memory_space<vmem>>, vector<8x8xf32>
      tpu.vector_store %arg13[%c0_51, %c8_52], %96 {strides = array<i32>} : memref<8x32xf32, #tpu.memory_space<vmem>>, vector<8x8xf32>,
      %c1_53 = arith.constant 1 : index
      %c0_54 = arith.constant 0 : index
      %c0_55 = arith.constant 0 : index
      %98 = vector.load %arg11[%c1_53, %c0_54, %c0_55] : memref<4x8x1xf32, #tpu.memory_space<vmem>>, vector<1x8x1xf32>
      %99 = vector.shape_cast %98 : vector<1x8x1xf32> to vector<8x1xf32>
      %100 = vector.shape_cast %76 : vector<8x1xf32> to vector<1x8x1xf32>
      tpu.vector_store %arg11[%c1_53, %c0_54, %c0_55], %100 {strides = array<i32>} : memref<4x8x1xf32, #tpu.memory_space<vmem>>, vector<1x8x1xf32>,
      %c0_56 = arith.constant 0 : index
      %c16 = arith.constant 16 : index
      %101 = vector.load %arg10[%c0_56, %c16] : memref<8x32xf32, #tpu.memory_space<vmem>>, vector<8x8xf32>
      %102 = vector.extract_strided_slice %24 {offsets = [0, 16], sizes = [8, 8], strides = [1, 1]} : vector<8x32xf32> to vector<8x8xf32>
      %cst_57 = arith.constant dense<0.000000e+00> : vector<8x8xf32>
      %103 = tpu.matmul %101, %102, %cst_57 {dimension_numbers = #tpu.dot_dimension_numbers<[1], [1], [0], [0], [0, 0, 1, 0], [], []>} : vector<8x8xf32>, vector<8x8xf32>, vector<8x8xf32> -> vector<8x8xf32>
      %cst_58 = arith.constant -2.38197633E+38 : f32
      %104 = vector.broadcast %cst_58 : f32 to vector<8x8xf32>
      %105 = arith.select %32, %104, %103 : vector<8x8xi1>, vector<8x8xf32>
      %c2 = arith.constant 2 : index
      %c0_59 = arith.constant 0 : index
      %c0_60 = arith.constant 0 : index
      %106 = vector.load %arg11[%c2, %c0_59, %c0_60] : memref<4x8x1xf32, #tpu.memory_space<vmem>>, vector<1x8x1xf32>
      %107 = vector.shape_cast %106 : vector<1x8x1xf32> to vector<8x1xf32>
      %cst_61 = arith.constant dense<0xFF800000> : vector<8xf32>
      %108 = vector.multi_reduction <maximumf>, %105, %cst_61 [1] : vector<8x8xf32> to vector<8xf32>
      %109 = vector.shape_cast %108 : vector<8xf32> to vector<8x1xf32>
      %110 = arith.maximumf %107, %109 : vector<8x1xf32>
      %111 = arith.subf %107, %110 : vector<8x1xf32>
      %112 = math.exp %111 : vector<8x1xf32>
      %113 = vector.broadcast %110 : vector<8x1xf32> to vector<8x8xf32>
      %114 = arith.subf %105, %113 : vector<8x8xf32>
      %115 = math.exp %114 : vector<8x8xf32>
      %c2_62 = arith.constant 2 : index
      %c0_63 = arith.constant 0 : index
      %c0_64 = arith.constant 0 : index
      %116 = vector.load %arg12[%c2_62, %c0_63, %c0_64] : memref<4x8x1xf32, #tpu.memory_space<vmem>>, vector<1x8x1xf32>
      %117 = vector.shape_cast %116 : vector<1x8x1xf32> to vector<8x1xf32>
      %118 = arith.mulf %112, %117 : vector<8x1xf32>
      %cst_65 = arith.constant dense<0.000000e+00> : vector<8xf32>
      %119 = vector.multi_reduction <add>, %115, %cst_65 [1] : vector<8x8xf32> to vector<8xf32>
      %120 = vector.shape_cast %119 : vector<8xf32> to vector<8x1xf32>
      %121 = arith.addf %118, %120 : vector<8x1xf32>
      %c2_66 = arith.constant 2 : index
      %c0_67 = arith.constant 0 : index
      %c0_68 = arith.constant 0 : index
      %122 = vector.load %arg12[%c2_66, %c0_67, %c0_68] : memref<4x8x1xf32, #tpu.memory_space<vmem>>, vector<1x8x1xf32>
      %123 = vector.shape_cast %122 : vector<1x8x1xf32> to vector<8x1xf32>
      %124 = vector.shape_cast %121 : vector<8x1xf32> to vector<1x8x1xf32>
      tpu.vector_store %arg12[%c2_66, %c0_67, %c0_68], %124 {strides = array<i32>} : memref<4x8x1xf32, #tpu.memory_space<vmem>>, vector<1x8x1xf32>,
      %c0_69 = arith.constant 0 : index
      %c16_70 = arith.constant 16 : index
      %125 = vector.load %arg13[%c0_69, %c16_70] : memref<8x32xf32, #tpu.memory_space<vmem>>, vector<8x8xf32>
      %126 = vector.broadcast %112 : vector<8x1xf32> to vector<8x8xf32>
      %127 = arith.mulf %126, %125 : vector<8x8xf32>
      %128 = vector.extract_strided_slice %25 {offsets = [0, 16], sizes = [8, 8], strides = [1, 1]} : vector<8x32xf32> to vector<8x8xf32>
      %cst_71 = arith.constant dense<0.000000e+00> : vector<8x8xf32>
      %129 = tpu.matmul %115, %128, %cst_71 {dimension_numbers = #tpu.dot_dimension_numbers<[1], [0], [0], [1], [0, 0, 1, 1], [], []>} : vector<8x8xf32>, vector<8x8xf32>, vector<8x8xf32> -> vector<8x8xf32>
      %130 = arith.addf %127, %129 : vector<8x8xf32>
      %c0_72 = arith.constant 0 : index
      %c16_73 = arith.constant 16 : index
      %131 = vector.load %arg13[%c0_72, %c16_73] : memref<8x32xf32, #tpu.memory_space<vmem>>, vector<8x8xf32>
      tpu.vector_store %arg13[%c0_72, %c16_73], %130 {strides = array<i32>} : memref<8x32xf32, #tpu.memory_space<vmem>>, vector<8x8xf32>,
      %c2_74 = arith.constant 2 : index
      %c0_75 = arith.constant 0 : index
      %c0_76 = arith.constant 0 : index
      %132 = vector.load %arg11[%c2_74, %c0_75, %c0_76] : memref<4x8x1xf32, #tpu.memory_space<vmem>>, vector<1x8x1xf32>
      %133 = vector.shape_cast %132 : vector<1x8x1xf32> to vector<8x1xf32>
      %134 = vector.shape_cast %110 : vector<8x1xf32> to vector<1x8x1xf32>
      tpu.vector_store %arg11[%c2_74, %c0_75, %c0_76], %134 {strides = array<i32>} : memref<4x8x1xf32, #tpu.memory_space<vmem>>, vector<1x8x1xf32>,
      %c0_77 = arith.constant 0 : index
      %c24 = arith.constant 24 : index
      %135 = vector.load %arg10[%c0_77, %c24] : memref<8x32xf32, #tpu.memory_space<vmem>>, vector<8x8xf32>
      %136 = vector.extract_strided_slice %24 {offsets = [0, 24], sizes = [8, 8], strides = [1, 1]} : vector<8x32xf32> to vector<8x8xf32>
      %cst_78 = arith.constant dense<0.000000e+00> : vector<8x8xf32>
      %137 = tpu.matmul %135, %136, %cst_78 {dimension_numbers = #tpu.dot_dimension_numbers<[1], [1], [0], [0], [0, 0, 1, 0], [], []>} : vector<8x8xf32>, vector<8x8xf32>, vector<8x8xf32> -> vector<8x8xf32>
      %cst_79 = arith.constant -2.38197633E+38 : f32
      %138 = vector.broadcast %cst_79 : f32 to vector<8x8xf32>
      %139 = arith.select %32, %138, %137 : vector<8x8xi1>, vector<8x8xf32>
      %c3 = arith.constant 3 : index
      %c0_80 = arith.constant 0 : index
      %c0_81 = arith.constant 0 : index
      %140 = vector.load %arg11[%c3, %c0_80, %c0_81] : memref<4x8x1xf32, #tpu.memory_space<vmem>>, vector<1x8x1xf32>
      %141 = vector.shape_cast %140 : vector<1x8x1xf32> to vector<8x1xf32>
      %cst_82 = arith.constant dense<0xFF800000> : vector<8xf32>
      %142 = vector.multi_reduction <maximumf>, %139, %cst_82 [1] : vector<8x8xf32> to vector<8xf32>
      %143 = vector.shape_cast %142 : vector<8xf32> to vector<8x1xf32>
      %144 = arith.maximumf %141, %143 : vector<8x1xf32>
      %145 = arith.subf %141, %144 : vector<8x1xf32>
      %146 = math.exp %145 : vector<8x1xf32>
      %147 = vector.broadcast %144 : vector<8x1xf32> to vector<8x8xf32>
      %148 = arith.subf %139, %147 : vector<8x8xf32>
      %149 = math.exp %148 : vector<8x8xf32>
      %c3_83 = arith.constant 3 : index
      %c0_84 = arith.constant 0 : index
      %c0_85 = arith.constant 0 : index
      %150 = vector.load %arg12[%c3_83, %c0_84, %c0_85] : memref<4x8x1xf32, #tpu.memory_space<vmem>>, vector<1x8x1xf32>
      %151 = vector.shape_cast %150 : vector<1x8x1xf32> to vector<8x1xf32>
      %152 = arith.mulf %146, %151 : vector<8x1xf32>
      %cst_86 = arith.constant dense<0.000000e+00> : vector<8xf32>
      %153 = vector.multi_reduction <add>, %149, %cst_86 [1] : vector<8x8xf32> to vector<8xf32>
      %154 = vector.shape_cast %153 : vector<8xf32> to vector<8x1xf32>
      %155 = arith.addf %152, %154 : vector<8x1xf32>
      %c3_87 = arith.constant 3 : index
      %c0_88 = arith.constant 0 : index
      %c0_89 = arith.constant 0 : index
      %156 = vector.load %arg12[%c3_87, %c0_88, %c0_89] : memref<4x8x1xf32, #tpu.memory_space<vmem>>, vector<1x8x1xf32>
      %157 = vector.shape_cast %156 : vector<1x8x1xf32> to vector<8x1xf32>
      %158 = vector.shape_cast %155 : vector<8x1xf32> to vector<1x8x1xf32>
      tpu.vector_store %arg12[%c3_87, %c0_88, %c0_89], %158 {strides = array<i32>} : memref<4x8x1xf32, #tpu.memory_space<vmem>>, vector<1x8x1xf32>,
      %c0_90 = arith.constant 0 : index
      %c24_91 = arith.constant 24 : index
      %159 = vector.load %arg13[%c0_90, %c24_91] : memref<8x32xf32, #tpu.memory_space<vmem>>, vector<8x8xf32>
      %160 = vector.broadcast %146 : vector<8x1xf32> to vector<8x8xf32>
      %161 = arith.mulf %160, %159 : vector<8x8xf32>
      %162 = vector.extract_strided_slice %25 {offsets = [0, 24], sizes = [8, 8], strides = [1, 1]} : vector<8x32xf32> to vector<8x8xf32>
      %cst_92 = arith.constant dense<0.000000e+00> : vector<8x8xf32>
      %163 = tpu.matmul %149, %162, %cst_92 {dimension_numbers = #tpu.dot_dimension_numbers<[1], [0], [0], [1], [0, 0, 1, 1], [], []>} : vector<8x8xf32>, vector<8x8xf32>, vector<8x8xf32> -> vector<8x8xf32>
      %164 = arith.addf %161, %163 : vector<8x8xf32>
      %c0_93 = arith.constant 0 : index
      %c24_94 = arith.constant 24 : index
      %165 = vector.load %arg13[%c0_93, %c24_94] : memref<8x32xf32, #tpu.memory_space<vmem>>, vector<8x8xf32>
      tpu.vector_store %arg13[%c0_93, %c24_94], %164 {strides = array<i32>} : memref<8x32xf32, #tpu.memory_space<vmem>>, vector<8x8xf32>,
      %c3_95 = arith.constant 3 : index
      %c0_96 = arith.constant 0 : index
      %c0_97 = arith.constant 0 : index
      %166 = vector.load %arg11[%c3_95, %c0_96, %c0_97] : memref<4x8x1xf32, #tpu.memory_space<vmem>>, vector<1x8x1xf32>
      %167 = vector.shape_cast %166 : vector<1x8x1xf32> to vector<8x1xf32>
      %168 = vector.shape_cast %144 : vector<8x1xf32> to vector<1x8x1xf32>
      tpu.vector_store %arg11[%c3_95, %c0_96, %c0_97], %168 {strides = array<i32>} : memref<4x8x1xf32, #tpu.memory_space<vmem>>, vector<1x8x1xf32>,
    } else {
    }
    %true = arith.constant true
    %13 = arith.xori %9, %true : i1
    %14 = arith.andi %6, %13 : i1
    %15 = arith.extui %14 : i1 to i32
    %c0_i32_5 = arith.constant 0 : i32
    %16 = arith.cmpi ne, %15, %c0_i32_5 : i32
    scf.if %16 {
      %c0 = arith.constant 0 : index
      %c0_8 = arith.constant 0 : index
      %c0_9 = arith.constant 0 : index
      %20 = vector.load %arg4[%c0, %c0_8, %c0_9] : memref<1x8x16xf32, #tpu.memory_space<vmem>>, vector<1x8x16xf32>
      %21 = vector.shape_cast %20 : vector<1x8x16xf32> to vector<8x16xf32>
      %c0_10 = arith.constant 0 : index
      %c0_11 = arith.constant 0 : index
      %22 = vector.load %arg6[%c0_10, %c0_11] : memref<16x64xf32, #tpu.memory_space<vmem>>, vector<16x64xf32>
      %cst = arith.constant dense<0.000000e+00> : vector<8x64xf32>
      %23 = tpu.matmul %21, %22, %cst {dimension_numbers = #tpu.dot_dimension_numbers<[1], [0], [0], [1], [0, 0, 1, 1], [], []>} : vector<8x16xf32>, vector<16x64xf32>, vector<8x64xf32> -> vector<8x64xf32>
      %24 = vector.extract_strided_slice %23 {offsets = [0, 0], sizes = [8, 32], strides = [1, 1]} : vector<8x64xf32> to vector<8x32xf32>
      %25 = vector.extract_strided_slice %23 {offsets = [0, 32], sizes = [8, 32], strides = [1, 1]} : vector<8x64xf32> to vector<8x32xf32>
      %c0_12 = arith.constant 0 : index
      %c0_13 = arith.constant 0 : index
      %26 = vector.load %arg10[%c0_12, %c0_13] : memref<8x32xf32, #tpu.memory_space<vmem>>, vector<8x8xf32>
      %27 = vector.extract_strided_slice %24 {offsets = [0, 0], sizes = [8, 8], strides = [1, 1]} : vector<8x32xf32> to vector<8x8xf32>
      %cst_14 = arith.constant dense<0.000000e+00> : vector<8x8xf32>
      %28 = tpu.matmul %26, %27, %cst_14 {dimension_numbers = #tpu.dot_dimension_numbers<[1], [1], [0], [0], [0, 0, 1, 0], [], []>} : vector<8x8xf32>, vector<8x8xf32>, vector<8x8xf32> -> vector<8x8xf32>
      %c0_15 = arith.constant 0 : index
      %c0_16 = arith.constant 0 : index
      %c0_17 = arith.constant 0 : index
      %29 = vector.load %arg11[%c0_15, %c0_16, %c0_17] : memref<4x8x1xf32, #tpu.memory_space<vmem>>, vector<1x8x1xf32>
      %30 = vector.shape_cast %29 : vector<1x8x1xf32> to vector<8x1xf32>
      %cst_18 = arith.constant dense<0xFF800000> : vector<8xf32>
      %31 = vector.multi_reduction <maximumf>, %28, %cst_18 [1] : vector<8x8xf32> to vector<8xf32>
      %32 = vector.shape_cast %31 : vector<8xf32> to vector<8x1xf32>
      %33 = arith.maximumf %30, %32 : vector<8x1xf32>
      %34 = arith.subf %30, %33 : vector<8x1xf32>
      %35 = math.exp %34 : vector<8x1xf32>
      %36 = vector.broadcast %33 : vector<8x1xf32> to vector<8x8xf32>
      %37 = arith.subf %28, %36 : vector<8x8xf32>
      %38 = math.exp %37 : vector<8x8xf32>
      %c0_19 = arith.constant 0 : index
      %c0_20 = arith.constant 0 : index
      %c0_21 = arith.constant 0 : index
      %39 = vector.load %arg12[%c0_19, %c0_20, %c0_21] : memref<4x8x1xf32, #tpu.memory_space<vmem>>, vector<1x8x1xf32>
      %40 = vector.shape_cast %39 : vector<1x8x1xf32> to vector<8x1xf32>
      %41 = arith.mulf %35, %40 : vector<8x1xf32>
      %cst_22 = arith.constant dense<0.000000e+00> : vector<8xf32>
      %42 = vector.multi_reduction <add>, %38, %cst_22 [1] : vector<8x8xf32> to vector<8xf32>
      %43 = vector.shape_cast %42 : vector<8xf32> to vector<8x1xf32>
      %44 = arith.addf %41, %43 : vector<8x1xf32>
      %c0_23 = arith.constant 0 : index
      %c0_24 = arith.constant 0 : index
      %c0_25 = arith.constant 0 : index
      %45 = vector.load %arg12[%c0_23, %c0_24, %c0_25] : memref<4x8x1xf32, #tpu.memory_space<vmem>>, vector<1x8x1xf32>
      %46 = vector.shape_cast %45 : vector<1x8x1xf32> to vector<8x1xf32>
      %47 = vector.shape_cast %44 : vector<8x1xf32> to vector<1x8x1xf32>
      tpu.vector_store %arg12[%c0_23, %c0_24, %c0_25], %47 {strides = array<i32>} : memref<4x8x1xf32, #tpu.memory_space<vmem>>, vector<1x8x1xf32>,
      %c0_26 = arith.constant 0 : index
      %c0_27 = arith.constant 0 : index
      %48 = vector.load %arg13[%c0_26, %c0_27] : memref<8x32xf32, #tpu.memory_space<vmem>>, vector<8x8xf32>
      %49 = vector.broadcast %35 : vector<8x1xf32> to vector<8x8xf32>
      %50 = arith.mulf %49, %48 : vector<8x8xf32>
      %51 = vector.extract_strided_slice %25 {offsets = [0, 0], sizes = [8, 8], strides = [1, 1]} : vector<8x32xf32> to vector<8x8xf32>
      %cst_28 = arith.constant dense<0.000000e+00> : vector<8x8xf32>
      %52 = tpu.matmul %38, %51, %cst_28 {dimension_numbers = #tpu.dot_dimension_numbers<[1], [0], [0], [1], [0, 0, 1, 1], [], []>} : vector<8x8xf32>, vector<8x8xf32>, vector<8x8xf32> -> vector<8x8xf32>
      %53 = arith.addf %50, %52 : vector<8x8xf32>
      %c0_29 = arith.constant 0 : index
      %c0_30 = arith.constant 0 : index
      %54 = vector.load %arg13[%c0_29, %c0_30] : memref<8x32xf32, #tpu.memory_space<vmem>>, vector<8x8xf32>
      tpu.vector_store %arg13[%c0_29, %c0_30], %53 {strides = array<i32>} : memref<8x32xf32, #tpu.memory_space<vmem>>, vector<8x8xf32>,
      %c0_31 = arith.constant 0 : index
      %c0_32 = arith.constant 0 : index
      %c0_33 = arith.constant 0 : index
      %55 = vector.load %arg11[%c0_31, %c0_32, %c0_33] : memref<4x8x1xf32, #tpu.memory_space<vmem>>, vector<1x8x1xf32>
      %56 = vector.shape_cast %55 : vector<1x8x1xf32> to vector<8x1xf32>
      %57 = vector.shape_cast %33 : vector<8x1xf32> to vector<1x8x1xf32>
      tpu.vector_store %arg11[%c0_31, %c0_32, %c0_33], %57 {strides = array<i32>} : memref<4x8x1xf32, #tpu.memory_space<vmem>>, vector<1x8x1xf32>,
      %c0_34 = arith.constant 0 : index
      %c8 = arith.constant 8 : index
      %58 = vector.load %arg10[%c0_34, %c8] : memref<8x32xf32, #tpu.memory_space<vmem>>, vector<8x8xf32>
      %59 = vector.extract_strided_slice %24 {offsets = [0, 8], sizes = [8, 8], strides = [1, 1]} : vector<8x32xf32> to vector<8x8xf32>
      %cst_35 = arith.constant dense<0.000000e+00> : vector<8x8xf32>
      %60 = tpu.matmul %58, %59, %cst_35 {dimension_numbers = #tpu.dot_dimension_numbers<[1], [1], [0], [0], [0, 0, 1, 0], [], []>} : vector<8x8xf32>, vector<8x8xf32>, vector<8x8xf32> -> vector<8x8xf32>
      %c1 = arith.constant 1 : index
      %c0_36 = arith.constant 0 : index
      %c0_37 = arith.constant 0 : index
      %61 = vector.load %arg11[%c1, %c0_36, %c0_37] : memref<4x8x1xf32, #tpu.memory_space<vmem>>, vector<1x8x1xf32>
      %62 = vector.shape_cast %61 : vector<1x8x1xf32> to vector<8x1xf32>
      %cst_38 = arith.constant dense<0xFF800000> : vector<8xf32>
      %63 = vector.multi_reduction <maximumf>, %60, %cst_38 [1] : vector<8x8xf32> to vector<8xf32>
      %64 = vector.shape_cast %63 : vector<8xf32> to vector<8x1xf32>
      %65 = arith.maximumf %62, %64 : vector<8x1xf32>
      %66 = arith.subf %62, %65 : vector<8x1xf32>
      %67 = math.exp %66 : vector<8x1xf32>
      %68 = vector.broadcast %65 : vector<8x1xf32> to vector<8x8xf32>
      %69 = arith.subf %60, %68 : vector<8x8xf32>
      %70 = math.exp %69 : vector<8x8xf32>
      %c1_39 = arith.constant 1 : index
      %c0_40 = arith.constant 0 : index
      %c0_41 = arith.constant 0 : index
      %71 = vector.load %arg12[%c1_39, %c0_40, %c0_41] : memref<4x8x1xf32, #tpu.memory_space<vmem>>, vector<1x8x1xf32>
      %72 = vector.shape_cast %71 : vector<1x8x1xf32> to vector<8x1xf32>
      %73 = arith.mulf %67, %72 : vector<8x1xf32>
      %cst_42 = arith.constant dense<0.000000e+00> : vector<8xf32>
      %74 = vector.multi_reduction <add>, %70, %cst_42 [1] : vector<8x8xf32> to vector<8xf32>
      %75 = vector.shape_cast %74 : vector<8xf32> to vector<8x1xf32>
      %76 = arith.addf %73, %75 : vector<8x1xf32>
      %c1_43 = arith.constant 1 : index
      %c0_44 = arith.constant 0 : index
      %c0_45 = arith.constant 0 : index
      %77 = vector.load %arg12[%c1_43, %c0_44, %c0_45] : memref<4x8x1xf32, #tpu.memory_space<vmem>>, vector<1x8x1xf32>
      %78 = vector.shape_cast %77 : vector<1x8x1xf32> to vector<8x1xf32>
      %79 = vector.shape_cast %76 : vector<8x1xf32> to vector<1x8x1xf32>
      tpu.vector_store %arg12[%c1_43, %c0_44, %c0_45], %79 {strides = array<i32>} : memref<4x8x1xf32, #tpu.memory_space<vmem>>, vector<1x8x1xf32>,
      %c0_46 = arith.constant 0 : index
      %c8_47 = arith.constant 8 : index
      %80 = vector.load %arg13[%c0_46, %c8_47] : memref<8x32xf32, #tpu.memory_space<vmem>>, vector<8x8xf32>
      %81 = vector.broadcast %67 : vector<8x1xf32> to vector<8x8xf32>
      %82 = arith.mulf %81, %80 : vector<8x8xf32>
      %83 = vector.extract_strided_slice %25 {offsets = [0, 8], sizes = [8, 8], strides = [1, 1]} : vector<8x32xf32> to vector<8x8xf32>
      %cst_48 = arith.constant dense<0.000000e+00> : vector<8x8xf32>
      %84 = tpu.matmul %70, %83, %cst_48 {dimension_numbers = #tpu.dot_dimension_numbers<[1], [0], [0], [1], [0, 0, 1, 1], [], []>} : vector<8x8xf32>, vector<8x8xf32>, vector<8x8xf32> -> vector<8x8xf32>
      %85 = arith.addf %82, %84 : vector<8x8xf32>
      %c0_49 = arith.constant 0 : index
      %c8_50 = arith.constant 8 : index
      %86 = vector.load %arg13[%c0_49, %c8_50] : memref<8x32xf32, #tpu.memory_space<vmem>>, vector<8x8xf32>
      tpu.vector_store %arg13[%c0_49, %c8_50], %85 {strides = array<i32>} : memref<8x32xf32, #tpu.memory_space<vmem>>, vector<8x8xf32>,
      %c1_51 = arith.constant 1 : index
      %c0_52 = arith.constant 0 : index
      %c0_53 = arith.constant 0 : index
      %87 = vector.load %arg11[%c1_51, %c0_52, %c0_53] : memref<4x8x1xf32, #tpu.memory_space<vmem>>, vector<1x8x1xf32>
      %88 = vector.shape_cast %87 : vector<1x8x1xf32> to vector<8x1xf32>
      %89 = vector.shape_cast %65 : vector<8x1xf32> to vector<1x8x1xf32>
      tpu.vector_store %arg11[%c1_51, %c0_52, %c0_53], %89 {strides = array<i32>} : memref<4x8x1xf32, #tpu.memory_space<vmem>>, vector<1x8x1xf32>,
      %c0_54 = arith.constant 0 : index
      %c16 = arith.constant 16 : index
      %90 = vector.load %arg10[%c0_54, %c16] : memref<8x32xf32, #tpu.memory_space<vmem>>, vector<8x8xf32>
      %91 = vector.extract_strided_slice %24 {offsets = [0, 16], sizes = [8, 8], strides = [1, 1]} : vector<8x32xf32> to vector<8x8xf32>
      %cst_55 = arith.constant dense<0.000000e+00> : vector<8x8xf32>
      %92 = tpu.matmul %90, %91, %cst_55 {dimension_numbers = #tpu.dot_dimension_numbers<[1], [1], [0], [0], [0, 0, 1, 0], [], []>} : vector<8x8xf32>, vector<8x8xf32>, vector<8x8xf32> -> vector<8x8xf32>
      %c2 = arith.constant 2 : index
      %c0_56 = arith.constant 0 : index
      %c0_57 = arith.constant 0 : index
      %93 = vector.load %arg11[%c2, %c0_56, %c0_57] : memref<4x8x1xf32, #tpu.memory_space<vmem>>, vector<1x8x1xf32>
      %94 = vector.shape_cast %93 : vector<1x8x1xf32> to vector<8x1xf32>
      %cst_58 = arith.constant dense<0xFF800000> : vector<8xf32>
      %95 = vector.multi_reduction <maximumf>, %92, %cst_58 [1] : vector<8x8xf32> to vector<8xf32>
      %96 = vector.shape_cast %95 : vector<8xf32> to vector<8x1xf32>
      %97 = arith.maximumf %94, %96 : vector<8x1xf32>
      %98 = arith.subf %94, %97 : vector<8x1xf32>
      %99 = math.exp %98 : vector<8x1xf32>
      %100 = vector.broadcast %97 : vector<8x1xf32> to vector<8x8xf32>
      %101 = arith.subf %92, %100 : vector<8x8xf32>
      %102 = math.exp %101 : vector<8x8xf32>
      %c2_59 = arith.constant 2 : index
      %c0_60 = arith.constant 0 : index
      %c0_61 = arith.constant 0 : index
      %103 = vector.load %arg12[%c2_59, %c0_60, %c0_61] : memref<4x8x1xf32, #tpu.memory_space<vmem>>, vector<1x8x1xf32>
      %104 = vector.shape_cast %103 : vector<1x8x1xf32> to vector<8x1xf32>
      %105 = arith.mulf %99, %104 : vector<8x1xf32>
      %cst_62 = arith.constant dense<0.000000e+00> : vector<8xf32>
      %106 = vector.multi_reduction <add>, %102, %cst_62 [1] : vector<8x8xf32> to vector<8xf32>
      %107 = vector.shape_cast %106 : vector<8xf32> to vector<8x1xf32>
      %108 = arith.addf %105, %107 : vector<8x1xf32>
      %c2_63 = arith.constant 2 : index
      %c0_64 = arith.constant 0 : index
      %c0_65 = arith.constant 0 : index
      %109 = vector.load %arg12[%c2_63, %c0_64, %c0_65] : memref<4x8x1xf32, #tpu.memory_space<vmem>>, vector<1x8x1xf32>
      %110 = vector.shape_cast %109 : vector<1x8x1xf32> to vector<8x1xf32>
      %111 = vector.shape_cast %108 : vector<8x1xf32> to vector<1x8x1xf32>
      tpu.vector_store %arg12[%c2_63, %c0_64, %c0_65], %111 {strides = array<i32>} : memref<4x8x1xf32, #tpu.memory_space<vmem>>, vector<1x8x1xf32>,
      %c0_66 = arith.constant 0 : index
      %c16_67 = arith.constant 16 : index
      %112 = vector.load %arg13[%c0_66, %c16_67] : memref<8x32xf32, #tpu.memory_space<vmem>>, vector<8x8xf32>
      %113 = vector.broadcast %99 : vector<8x1xf32> to vector<8x8xf32>
      %114 = arith.mulf %113, %112 : vector<8x8xf32>
      %115 = vector.extract_strided_slice %25 {offsets = [0, 16], sizes = [8, 8], strides = [1, 1]} : vector<8x32xf32> to vector<8x8xf32>
      %cst_68 = arith.constant dense<0.000000e+00> : vector<8x8xf32>
      %116 = tpu.matmul %102, %115, %cst_68 {dimension_numbers = #tpu.dot_dimension_numbers<[1], [0], [0], [1], [0, 0, 1, 1], [], []>} : vector<8x8xf32>, vector<8x8xf32>, vector<8x8xf32> -> vector<8x8xf32>
      %117 = arith.addf %114, %116 : vector<8x8xf32>
      %c0_69 = arith.constant 0 : index
      %c16_70 = arith.constant 16 : index
      %118 = vector.load %arg13[%c0_69, %c16_70] : memref<8x32xf32, #tpu.memory_space<vmem>>, vector<8x8xf32>
      tpu.vector_store %arg13[%c0_69, %c16_70], %117 {strides = array<i32>} : memref<8x32xf32, #tpu.memory_space<vmem>>, vector<8x8xf32>,
      %c2_71 = arith.constant 2 : index
      %c0_72 = arith.constant 0 : index
      %c0_73 = arith.constant 0 : index
      %119 = vector.load %arg11[%c2_71, %c0_72, %c0_73] : memref<4x8x1xf32, #tpu.memory_space<vmem>>, vector<1x8x1xf32>
      %120 = vector.shape_cast %119 : vector<1x8x1xf32> to vector<8x1xf32>
      %121 = vector.shape_cast %97 : vector<8x1xf32> to vector<1x8x1xf32>
      tpu.vector_store %arg11[%c2_71, %c0_72, %c0_73], %121 {strides = array<i32>} : memref<4x8x1xf32, #tpu.memory_space<vmem>>, vector<1x8x1xf32>,
      %c0_74 = arith.constant 0 : index
      %c24 = arith.constant 24 : index
      %122 = vector.load %arg10[%c0_74, %c24] : memref<8x32xf32, #tpu.memory_space<vmem>>, vector<8x8xf32>
      %123 = vector.extract_strided_slice %24 {offsets = [0, 24], sizes = [8, 8], strides = [1, 1]} : vector<8x32xf32> to vector<8x8xf32>
      %cst_75 = arith.constant dense<0.000000e+00> : vector<8x8xf32>
      %124 = tpu.matmul %122, %123, %cst_75 {dimension_numbers = #tpu.dot_dimension_numbers<[1], [1], [0], [0], [0, 0, 1, 0], [], []>} : vector<8x8xf32>, vector<8x8xf32>, vector<8x8xf32> -> vector<8x8xf32>
      %c3 = arith.constant 3 : index
      %c0_76 = arith.constant 0 : index
      %c0_77 = arith.constant 0 : index
      %125 = vector.load %arg11[%c3, %c0_76, %c0_77] : memref<4x8x1xf32, #tpu.memory_space<vmem>>, vector<1x8x1xf32>
      %126 = vector.shape_cast %125 : vector<1x8x1xf32> to vector<8x1xf32>
      %cst_78 = arith.constant dense<0xFF800000> : vector<8xf32>
      %127 = vector.multi_reduction <maximumf>, %124, %cst_78 [1] : vector<8x8xf32> to vector<8xf32>
      %128 = vector.shape_cast %127 : vector<8xf32> to vector<8x1xf32>
      %129 = arith.maximumf %126, %128 : vector<8x1xf32>
      %130 = arith.subf %126, %129 : vector<8x1xf32>
      %131 = math.exp %130 : vector<8x1xf32>
      %132 = vector.broadcast %129 : vector<8x1xf32> to vector<8x8xf32>
      %133 = arith.subf %124, %132 : vector<8x8xf32>
      %134 = math.exp %133 : vector<8x8xf32>
      %c3_79 = arith.constant 3 : index
      %c0_80 = arith.constant 0 : index
      %c0_81 = arith.constant 0 : index
      %135 = vector.load %arg12[%c3_79, %c0_80, %c0_81] : memref<4x8x1xf32, #tpu.memory_space<vmem>>, vector<1x8x1xf32>
      %136 = vector.shape_cast %135 : vector<1x8x1xf32> to vector<8x1xf32>
      %137 = arith.mulf %131, %136 : vector<8x1xf32>
      %cst_82 = arith.constant dense<0.000000e+00> : vector<8xf32>
      %138 = vector.multi_reduction <add>, %134, %cst_82 [1] : vector<8x8xf32> to vector<8xf32>
      %139 = vector.shape_cast %138 : vector<8xf32> to vector<8x1xf32>
      %140 = arith.addf %137, %139 : vector<8x1xf32>
      %c3_83 = arith.constant 3 : index
      %c0_84 = arith.constant 0 : index
      %c0_85 = arith.constant 0 : index
      %141 = vector.load %arg12[%c3_83, %c0_84, %c0_85] : memref<4x8x1xf32, #tpu.memory_space<vmem>>, vector<1x8x1xf32>
      %142 = vector.shape_cast %141 : vector<1x8x1xf32> to vector<8x1xf32>
      %143 = vector.shape_cast %140 : vector<8x1xf32> to vector<1x8x1xf32>
      tpu.vector_store %arg12[%c3_83, %c0_84, %c0_85], %143 {strides = array<i32>} : memref<4x8x1xf32, #tpu.memory_space<vmem>>, vector<1x8x1xf32>,
      %c0_86 = arith.constant 0 : index
      %c24_87 = arith.constant 24 : index
      %144 = vector.load %arg13[%c0_86, %c24_87] : memref<8x32xf32, #tpu.memory_space<vmem>>, vector<8x8xf32>
      %145 = vector.broadcast %131 : vector<8x1xf32> to vector<8x8xf32>
      %146 = arith.mulf %145, %144 : vector<8x8xf32>
      %147 = vector.extract_strided_slice %25 {offsets = [0, 24], sizes = [8, 8], strides = [1, 1]} : vector<8x32xf32> to vector<8x8xf32>
      %cst_88 = arith.constant dense<0.000000e+00> : vector<8x8xf32>
      %148 = tpu.matmul %134, %147, %cst_88 {dimension_numbers = #tpu.dot_dimension_numbers<[1], [0], [0], [1], [0, 0, 1, 1], [], []>} : vector<8x8xf32>, vector<8x8xf32>, vector<8x8xf32> -> vector<8x8xf32>
      %149 = arith.addf %146, %148 : vector<8x8xf32>
      %c0_89 = arith.constant 0 : index
      %c24_90 = arith.constant 24 : index
      %150 = vector.load %arg13[%c0_89, %c24_90] : memref<8x32xf32, #tpu.memory_space<vmem>>, vector<8x8xf32>
      tpu.vector_store %arg13[%c0_89, %c24_90], %149 {strides = array<i32>} : memref<8x32xf32, #tpu.memory_space<vmem>>, vector<8x8xf32>,
      %c3_91 = arith.constant 3 : index
      %c0_92 = arith.constant 0 : index
      %c0_93 = arith.constant 0 : index
      %151 = vector.load %arg11[%c3_91, %c0_92, %c0_93] : memref<4x8x1xf32, #tpu.memory_space<vmem>>, vector<1x8x1xf32>
      %152 = vector.shape_cast %151 : vector<1x8x1xf32> to vector<8x1xf32>
      %153 = vector.shape_cast %129 : vector<8x1xf32> to vector<1x8x1xf32>
      tpu.vector_store %arg11[%c3_91, %c0_92, %c0_93], %153 {strides = array<i32>} : memref<4x8x1xf32, #tpu.memory_space<vmem>>, vector<1x8x1xf32>,
    } else {
    }
    %c0_i32_6 = arith.constant 0 : i32
    %17 = arith.cmpi eq, %arg2, %c0_i32_6 : i32
    %18 = arith.extui %17 : i1 to i32
    %c0_i32_7 = arith.constant 0 : i32
    %19 = arith.cmpi ne, %18, %c0_i32_7 : i32
    scf.if %19 {
      %c0 = arith.constant 0 : index
      %c0_8 = arith.constant 0 : index
      %20 = vector.load %arg13[%c0, %c0_8] : memref<8x32xf32, #tpu.memory_space<vmem>>, vector<8x8xf32>
      %c0_9 = arith.constant 0 : index
      %c0_10 = arith.constant 0 : index
      %c0_11 = arith.constant 0 : index
      %21 = vector.load %arg12[%c0_9, %c0_10, %c0_11] : memref<4x8x1xf32, #tpu.memory_space<vmem>>, vector<1x8x1xf32>
      %22 = vector.shape_cast %21 : vector<1x8x1xf32> to vector<8x1xf32>
      %23 = tpu.reciprocal %22 {approx = true} : vector<8x1xf32> -> vector<8x1xf32>
      %24 = vector.broadcast %23 : vector<8x1xf32> to vector<8x8xf32>
      %25 = arith.mulf %20, %24 : vector<8x8xf32>
      %c0_12 = arith.constant 0 : index
      %c0_13 = arith.constant 0 : index
      %26 = vector.load %arg13[%c0_12, %c0_13] : memref<8x32xf32, #tpu.memory_space<vmem>>, vector<8x8xf32>
      tpu.vector_store %arg13[%c0_12, %c0_13], %25 {strides = array<i32>} : memref<8x32xf32, #tpu.memory_space<vmem>>, vector<8x8xf32>,
      %c0_14 = arith.constant 0 : index
      %c8 = arith.constant 8 : index
      %27 = vector.load %arg13[%c0_14, %c8] : memref<8x32xf32, #tpu.memory_space<vmem>>, vector<8x8xf32>
      %c1 = arith.constant 1 : index
      %c0_15 = arith.constant 0 : index
      %c0_16 = arith.constant 0 : index
      %28 = vector.load %arg12[%c1, %c0_15, %c0_16] : memref<4x8x1xf32, #tpu.memory_space<vmem>>, vector<1x8x1xf32>
      %29 = vector.shape_cast %28 : vector<1x8x1xf32> to vector<8x1xf32>
      %30 = tpu.reciprocal %29 {approx = true} : vector<8x1xf32> -> vector<8x1xf32>
      %31 = vector.broadcast %30 : vector<8x1xf32> to vector<8x8xf32>
      %32 = arith.mulf %27, %31 : vector<8x8xf32>
      %c0_17 = arith.constant 0 : index
      %c8_18 = arith.constant 8 : index
      %33 = vector.load %arg13[%c0_17, %c8_18] : memref<8x32xf32, #tpu.memory_space<vmem>>, vector<8x8xf32>
      tpu.vector_store %arg13[%c0_17, %c8_18], %32 {strides = array<i32>} : memref<8x32xf32, #tpu.memory_space<vmem>>, vector<8x8xf32>,
      %c0_19 = arith.constant 0 : index
      %c16 = arith.constant 16 : index
      %34 = vector.load %arg13[%c0_19, %c16] : memref<8x32xf32, #tpu.memory_space<vmem>>, vector<8x8xf32>
      %c2 = arith.constant 2 : index
      %c0_20 = arith.constant 0 : index
      %c0_21 = arith.constant 0 : index
      %35 = vector.load %arg12[%c2, %c0_20, %c0_21] : memref<4x8x1xf32, #tpu.memory_space<vmem>>, vector<1x8x1xf32>
      %36 = vector.shape_cast %35 : vector<1x8x1xf32> to vector<8x1xf32>
      %37 = tpu.reciprocal %36 {approx = true} : vector<8x1xf32> -> vector<8x1xf32>
      %38 = vector.broadcast %37 : vector<8x1xf32> to vector<8x8xf32>
      %39 = arith.mulf %34, %38 : vector<8x8xf32>
      %c0_22 = arith.constant 0 : index
      %c16_23 = arith.constant 16 : index
      %40 = vector.load %arg13[%c0_22, %c16_23] : memref<8x32xf32, #tpu.memory_space<vmem>>, vector<8x8xf32>
      tpu.vector_store %arg13[%c0_22, %c16_23], %39 {strides = array<i32>} : memref<8x32xf32, #tpu.memory_space<vmem>>, vector<8x8xf32>,
      %c0_24 = arith.constant 0 : index
      %c24 = arith.constant 24 : index
      %41 = vector.load %arg13[%c0_24, %c24] : memref<8x32xf32, #tpu.memory_space<vmem>>, vector<8x8xf32>
      %c3 = arith.constant 3 : index
      %c0_25 = arith.constant 0 : index
      %c0_26 = arith.constant 0 : index
      %42 = vector.load %arg12[%c3, %c0_25, %c0_26] : memref<4x8x1xf32, #tpu.memory_space<vmem>>, vector<1x8x1xf32>
      %43 = vector.shape_cast %42 : vector<1x8x1xf32> to vector<8x1xf32>
      %44 = tpu.reciprocal %43 {approx = true} : vector<8x1xf32> -> vector<8x1xf32>
      %45 = vector.broadcast %44 : vector<8x1xf32> to vector<8x8xf32>
      %46 = arith.mulf %41, %45 : vector<8x8xf32>
      %c0_27 = arith.constant 0 : index
      %c24_28 = arith.constant 24 : index
      %47 = vector.load %arg13[%c0_27, %c24_28] : memref<8x32xf32, #tpu.memory_space<vmem>>, vector<8x8xf32>
      tpu.vector_store %arg13[%c0_27, %c24_28], %46 {strides = array<i32>} : memref<8x32xf32, #tpu.memory_space<vmem>>, vector<8x8xf32>,
      %c0_29 = arith.constant 0 : index
      %c0_30 = arith.constant 0 : index
      %48 = vector.load %arg13[%c0_29, %c0_30] : memref<8x32xf32, #tpu.memory_space<vmem>>, vector<8x32xf32>
      %c0_31 = arith.constant 0 : index
      %c0_32 = arith.constant 0 : index
      %49 = vector.load %arg7[%c0_31, %c0_32] : memref<32x32xf32, #tpu.memory_space<vmem>>, vector<32x32xf32>
      %cst = arith.constant dense<0.000000e+00> : vector<8x32xf32>
      %50 = tpu.matmul %48, %49, %cst {dimension_numbers = #tpu.dot_dimension_numbers<[1], [0], [0], [1], [0, 0, 1, 1], [], []>} : vector<8x32xf32>, vector<32x32xf32>, vector<8x32xf32> -> vector<8x32xf32>
      %c0_33 = arith.constant 0 : index
      %c0_34 = arith.constant 0 : index
      %51 = vector.load %arg8[%c0_33, %c0_34] : memref<1x32xf32, #tpu.memory_space<vmem>>, vector<1x32xf32>
      %52 = vector.broadcast %51 : vector<1x32xf32> to vector<8x32xf32>
      %53 = arith.addf %50, %52 : vector<8x32xf32>
      %c0_35 = arith.constant 0 : index
      %c0_36 = arith.constant 0 : index
      %c0_37 = arith.constant 0 : index
      %54 = vector.load %arg9[%c0_35, %c0_36, %c0_37] : memref<1x8x32xf32, #tpu.memory_space<vmem>>, vector<1x8x32xf32>
      %55 = vector.shape_cast %54 : vector<1x8x32xf32> to vector<8x32xf32>
      %56 = vector.shape_cast %53 : vector<8x32xf32> to vector<1x8x32xf32>
      tpu.vector_store %arg9[%c0_35, %c0_36, %c0_37], %56 {strides = array<i32>} : memref<1x8x32xf32, #tpu.memory_space<vmem>>, vector<1x8x32xf32>,
    } else {
    }
    return
  }
  func.func @transform_0(%arg0: i32, %arg1: i32, %arg2: i32) -> (i32, i32, i32) {
    %c0_i32 = arith.constant 0 : i32
    %c0_i32_0 = arith.constant 0 : i32
    return %arg0, %arg1, %c0_i32 : i32, i32, i32
  }
  func.func @transform_1(%arg0: i32, %arg1: i32, %arg2: i32) -> (i32, i32, i32) {
    %c0_i32 = arith.constant 0 : i32
    %c0_i32_0 = arith.constant 0 : i32
    return %arg0, %arg2, %c0_i32 : i32, i32, i32
  }
  func.func @transform_2(%arg0: i32, %arg1: i32, %arg2: i32) -> (i32, i32) {
    %c0_i32 = arith.constant 0 : i32
    %c0_i32_0 = arith.constant 0 : i32
    %c0_i32_1 = arith.constant 0 : i32
    return %c0_i32, %c0_i32_0 : i32, i32
  }
  func.func @transform_3(%arg0: i32, %arg1: i32, %arg2: i32) -> (i32, i32) {
    %c0_i32 = arith.constant 0 : i32
    %c0_i32_0 = arith.constant 0 : i32
    %c0_i32_1 = arith.constant 0 : i32
    return %c0_i32, %c0_i32_0 : i32, i32
  }
  func.func @transform_4(%arg0: i32, %arg1: i32, %arg2: i32) -> (i32, i32) {
    %c0_i32 = arith.constant 0 : i32
    %c0_i32_0 = arith.constant 0 : i32
    %c0_i32_1 = arith.constant 0 : i32
    return %c0_i32, %c0_i32_0 : i32, i32
  }
  func.func @transform_5(%arg0: i32, %arg1: i32, %arg2: i32) -> (i32, i32) {
    %c0_i32 = arith.constant 0 : i32
    %c0_i32_0 = arith.constant 0 : i32
    %c0_i32_1 = arith.constant 0 : i32
    return %c0_i32, %c0_i32_0 : i32, i32
  }
  func.func @transform_6(%arg0: i32, %arg1: i32, %arg2: i32) -> (i32, i32, i32) {
    %c0_i32 = arith.constant 0 : i32
    %c0_i32_0 = arith.constant 0 : i32
    return %arg0, %arg1, %c0_i32 : i32, i32, i32
  }
}

</mosaic_0001>

<bundles_post_ra>
// kernel: multi_head_attention.1
= control target key start
LH: loop header
LB: loop body
LE: loop exit
PB: predicated region body
PF: predicated region fallthrough
CT: control target
= control target key end

     0   :  { %s3647_s0 = inlined_call_operand.hbm [shape: f32[2,8,16], index: 0, kind: input, shape index: {}, may-alias: {0,1}]   ;;  %s3648_s1 = inlined_call_operand.hbm [shape: f32[2,8,16], index: 1, kind: input, shape index: {}, may-alias: {0,1}]   ;;  %s3649_s2 = inlined_call_operand.hbm [shape: f32[16,32], index: 2, kind: input, shape index: {}]   ;;  %s3650_s3 = inlined_call_operand.hbm [shape: f32[16,64], index: 3, kind: input, shape index: {}]   ;;  %s3651_s4 = inlined_call_operand.hbm [shape: f32[32,32], index: 4, kind: input, shape index: {}]   ;;  %s3652_s5 = inlined_call_operand.hbm [shape: f32[1,32], index: 5, kind: input, shape index: {}]   ;;  %s3653_s6 = inlined_call_operand.hbm [shape: f32[2,8,32], index: 6, kind: output, shape index: {}]  }
   0x1   :  { %3659 = sst [smem:[#allocation25_spill]] %s3649_s2 }
   0x2   :  { %3660 = sst [smem:[#allocation26_spill]] %s3650_s3 }
   0x3   :  { %3661 = sst [smem:[#allocation27_spill]] %s3651_s4 }
   0x4   :  { %3662 = sst [smem:[#allocation28_spill]] %s3652_s5 }
   0x5   :  { %11 = vsyncpa [#allocation7], 0 }
   0x6   :  { %13 = vsyncpa [#allocation7 + $0x1], 0 }
   0x7   :  { %14 = vsyncpa [#allocation10], 0 }
   0x8   :  { %16 = vsyncpa [#allocation10 + $0x1], 0 }
   0x9   :  { %17 = vsyncpa [#allocation13], 0 }
   0xa   :  { %18 = vsyncpa [#allocation16], 0 }
   0xb   :  { %19 = vsyncpa [#allocation8], 0 }
   0xc   :  { %21 = vsyncpa [#allocation8 + $0x1], 0  ;;  %s3151_s21 = smov 0   ;;  %s3153_s22 = smov 0  }
   0xd   :  { %s3155_s23 = smov 0   ;;  %s3157_s24 = smov 0  }
   0xe   :  { %s3159_s25 = smov 0   ;;  %s3161_s26 = smov 0  }
   0xf LB: > { %s3182_s27 = sadd.s32 4294967295, %s3090_s26   ;;  %p2514_p0 = scmp.ge.s32.totalorder %s3090_s26, 1  ;;  %s3090_s26 = sphi %s3161_s26, %s27_s26   ;;  %s3086_s25 = sphi %s3159_s25, %s3693_s25   ;;  %s3082_s24 = sphi %s3157_s24, %s3692_s24   ;;  %s3078_s23 = sphi %s3155_s23, %s3691_s23   ;;  %s3074_s22 = sphi %s3153_s22, %s3690_s22   ;;  %s3070_s21 = sphi %s3151_s21, %s3689_s21  }
  0x10   : > { %p3654_p1 = scmp.eq.s32.totalorder %s3182_s27, 0  ;;  %p219_p2 = scmp.lt.s32.totalorder %s3090_s26, 3 }
  0x11   : > { %s3092_s29 = smov [#allocation11]   ;;  %s3093_s8 = smov [#allocation12]  }
  0x12   : > { %p3187_p3 = pnand %p2514_p0, %p219_p2  ;;  %s231_s30 = sshll.u32 %s3092_s29, 4  ;;  %s3191_s30 = int_to_ptr.vmem [resolvable:$true] %s231_s30 }
  0x13   : > { %s244_s9 = sshll.u32 %s3093_s8, 4  ;;  %s3094_s10 = smov [#allocation14]   ;;  %s3202_s9 = int_to_ptr.vmem [resolvable:$true] %s244_s9 }
  0x14   : > { %s3663_s28 = scalar_select %p3187_p3, 1, 0 }
  0x15   : > { %p2691_p4 = pneg %p3187_p3  ;;  %s3204_s11 = sshll.u32 %s3094_s10, 4  ;;  %s258_s11 = int_to_ptr.vmem [resolvable:$true] %s3204_s11 }
  0x16   : > { %s3665_s2 = sld [smem:[#allocation25_spill]] }
  0x17   : > { %p3198_p6 = pnand %p2691_p4, %p3654_p1 }
  0x19   : > { %p3214_p8 = pneg %p3198_p6 }
  0x1c   : > { %s2820_s14 = scalar_lea.hbm %s3665_s2, 256 }
  0x1d   : > { %p2821_p7 = scmp.ne.s32.totalorder %s3665_s2, %s2820_s14  ;;  %p2827_p11 = scmp.lt.u32.totalorder %s2820_s14, %s3665_s2 }
  0x1f   : > { %p2823_p9 = pnand %p3214_p8, %p2821_p7 }
  0x21   : > { %p2824_p10 = pneg %p2823_p9 }
  0x23   : > { %p2829_p12 = pnand %p2827_p11, %p2824_p10 }
  0x25   : > { %2832 = shalt.err (!%p2829_p12)
}
  0x26   : > { %s2833_s20 = scalar_lea.vmem %s3191_s30, 256  ;;  %p2841_p4 = scmp.lt.s32.totalorder %s3191_s30, %s3191_s30 }
  0x27   : > { %p2834_p13 = scmp.ne.s32.totalorder %s3191_s30, %s2833_s20  ;;  %p2842_p5 = scmp.lt.s32.totalorder %s2833_s20, %s2833_s20 }
  0x29   : > { %p2836_p0 = pnand %p2834_p13, %p3214_p8  ;;  %p2843_p7 = por %p2842_p5, %p2841_p4 }
  0x2b   : > { %p2837_p2 = pneg %p2836_p0 }
  0x2d   : > { %p2844_p9 = pnand %p2843_p7, %p2837_p2 }
  0x2f   : > { %2847 = shalt.err (!%p2844_p9)
}
  0x30   : > { %s3095_s29 = smov 128   ;;  %s3096_s8 = smov 8  }
  0x31   : > { %2694 = dma.hbm_to_vmem [thread:$0]  (!%p3198_p6), %s3665_s2, 256, %s3191_s30, [#allocation10], %s3095_s29, %s3095_s29, %s3096_s8  }
  0x32   : > { %s3667_s3 = sld [smem:[#allocation26_spill]] }
  0x38   : > { %s2848_s15 = scalar_lea.hbm %s3667_s3, 256 }
  0x39   : > { %p2849_p5 = scmp.ne.s32.totalorder %s3667_s3, %s2848_s15  ;;  %p2855_p12 = scmp.lt.u32.totalorder %s2848_s15, %s3667_s3 }
  0x3b   : > { %p2851_p10 = pnand %p2849_p5, %p3214_p8 }
  0x3d   : > { %p2852_p11 = pneg %p2851_p10 }
  0x3f   : > { %p2857_p13 = pnand %p2855_p12, %p2852_p11 }
  0x41   : > { %2860 = shalt.err (!%p2857_p13)
}
  0x42   : > { %s2861_s30 = scalar_lea.vmem %s3202_s9, 256  ;;  %p2869_p7 = scmp.lt.s32.totalorder %s3202_s9, %s3202_s9 }
  0x43   : > { %p2862_p0 = scmp.ne.s32.totalorder %s3202_s9, %s2861_s30  ;;  %p2870_p9 = scmp.lt.s32.totalorder %s2861_s30, %s2861_s30 }
  0x45   : > { %p2864_p2 = pnand %p2862_p0, %p3214_p8  ;;  %p2871_p5 = por %p2870_p9, %p2869_p7 }
  0x47   : > { %p2865_p4 = pneg %p2864_p2 }
  0x49   : > { %p2872_p10 = pnand %p2871_p5, %p2865_p4 }
  0x4b   : > { %2875 = shalt.err (!%p2872_p10)
}
  0x4c   : > { %2697 = dma.hbm_to_vmem [thread:$0]  (!%p3198_p6), %s3667_s3, 256, %s3202_s9, [#allocation13], %s3095_s29, %s3095_s29, %s3096_s8  }
  0x4d   : > { %s3668_s4 = sld [smem:[#allocation27_spill]] }
  0x53   : > { %s2876_s15 = scalar_lea.hbm %s3668_s4, 512 }
  0x54   : > { %p2877_p11 = scmp.ne.s32.totalorder %s3668_s4, %s2876_s15  ;;  %p2883_p0 = scmp.lt.u32.totalorder %s2876_s15, %s3668_s4 }
  0x56   : > { %p2879_p12 = pnand %p2877_p11, %p3214_p8 }
  0x58   : > { %p2880_p13 = pneg %p2879_p12 }
  0x5a   : > { %p2885_p2 = pnand %p2883_p0, %p2880_p13 }
  0x5c   : > { %2888 = shalt.err (!%p2885_p2)
}
  0x5d   : > { %s2889_s30 = scalar_lea.vmem %s258_s11, 512  ;;  %p2897_p5 = scmp.lt.s32.totalorder %s258_s11, %s258_s11 }
  0x5e   : > { %p2890_p4 = scmp.ne.s32.totalorder %s258_s11, %s2889_s30  ;;  %p2898_p10 = scmp.lt.s32.totalorder %s2889_s30, %s2889_s30 }
  0x60   : > { %p2892_p7 = pnand %p2890_p4, %p3214_p8  ;;  %p2899_p1 = por %p2898_p10, %p2897_p5 }
  0x62   : > { %p2893_p9 = pneg %p2892_p7 }
  0x64   : > { %p2900_p3 = pnand %p2899_p1, %p2893_p9 }
  0x66   : > { %2903 = shalt.err (!%p2900_p3)
}
  0x67   : > { %2700 = dma.hbm_to_vmem [thread:$0]  (!%p3198_p6), %s3668_s4, 512, %s258_s11, [#allocation13], %s3095_s29, %s3095_s29, %s3096_s8  }
  0x68   : > { %s3097_s12 = smov [#allocation15]   ;;  %s3669_s5 = sld [smem:[#allocation28_spill]] }
  0x69   : > { %s271_s13 = sshll.u32 %s3097_s12, 4  ;;  %s272_s13 = int_to_ptr.vmem [resolvable:$true] %s271_s13 }
  0x6e   : > { %s2904_s16 = scalar_lea.hbm %s3669_s5, 16 }
  0x6f   : > { %p2905_p1 = scmp.ne.s32.totalorder %s3669_s5, %s2904_s16  ;;  %p2911_p12 = scmp.lt.u32.totalorder %s2904_s16, %s3669_s5 }
  0x71   : > { %p2907_p3 = pnand %p2905_p1, %p3214_p8 }
  0x73   : > { %p2908_p11 = pneg %p2907_p3 }
  0x75   : > { %p2913_p13 = pnand %p2911_p12, %p2908_p11 }
  0x77   : > { %2916 = shalt.err (!%p2913_p13)
}
  0x78   : > { %s2917_s11 = scalar_lea.vmem %s272_s13, 16  ;;  %s2924_s29 = scalar_lea.vmem %s272_s13, 32 }
  0x79   : > { %p2918_p0 = scmp.ne.s32.totalorder %s272_s13, %s2917_s11  ;;  %p2925_p7 = scmp.lt.s32.totalorder %s272_s13, %s272_s13 }
  0x7a   : > { %p2926_p9 = scmp.lt.s32.totalorder %s2924_s29, %s2917_s11 }
  0x7b   : > { %p2920_p2 = pnand %p2918_p0, %p3214_p8 }
  0x7c   : > { %p2927_p5 = por %p2926_p9, %p2925_p7 }
  0x7d   : > { %p2921_p4 = pneg %p2920_p2 }
  0x7f   : > { %p2928_p10 = pnand %p2927_p5, %p2921_p4 }
  0x81   : > { %2931 = shalt.err (!%p2928_p10)
}
  0x82   : > { %2703 = dma.hbm_to_vmem [thread:$0]  (!%p3198_p6), %s3669_s5, 16, %s272_s13, [#allocation16]  }
  0x83   : > { %s2513_s17 = sadd.s32 4294967294, %s3090_s26   ;;  %s46_s10 = sadd.s32 1, %s3086_s25 }
  0x84   : > { %p48_p8 = scmp.ge.s32.totalorder %s46_s10, 2  ;;  %s55_s7 = sadd.s32 1, %s3078_s23 }
  0x85   : > { %p62_p1 = scmp.ne.s32.totalorder %s3078_s23, %s3074_s22  ;;  %p63_p3 = scmp.eq.s32.totalorder %s3090_s26, 0 }
  0x86   : > { %s3695_s10 = smov (%p48_p8, %s46_s10), 0  ;;  %p68_p12 = scmp.ne.s32.totalorder %s3074_s22, %s3070_s21 }
  0x87   : > { %3670 = sst [smem:[#allocation24_spill]] %s3695_s10  ;;  %p3312_p11 = por %p63_p3, %p62_p1 }
  0x88   : > { %s50_s13 = ssub.s32 %s3086_s25, %s3695_s10  ;;  %p206_p6 = scmp.eq.s32.totalorder %s3182_s27, 1 }
  0x89   : > { %p53_p13 = scmp.eq.s32.totalorder %s50_s13, 0  ;;  %p3672_p0 = scmp.eq.s32.totalorder %s3182_s27, 0 }
  0x8a   : > { %p3327_p4 = por %p206_p6, %p62_p1  ;;  %p212_p7 = scmp.eq.s32.totalorder %s2513_s17, 1 }
  0x8b   : > { %p3323_p2 = por %p3672_p0, %p68_p12  ;;  %p2719_p5 = scmp.lt.s32.totalorder %s3090_s26, 2 }
  0x8c   : > { %s3674_s15 = scalar_select %p3327_p4, 1, 0 }
  0x8d   : > { %s3673_s14 = scalar_select %p3323_p2, 1, 0 }
  0x8e   : > { %s3332_s16 = scalar_select %p53_p13, %s3078_s23, %s55_s7  }
  0x8f   : > { %p3334_p9 = por %p212_p7, %p68_p12  ;;  %s282_s19 = sand.u32 1, %s3078_s23  }
  0x90   : > { %s2521_s20 = sshll.u32 %s3086_s25, 7  ;;  %s3341_s30 = sshll.u32 %s282_s19, 3 }
  0x91   : > { %s3675_s18 = scalar_select %p3334_p9, 1, 0 }
  0x92   : > { %s3346_s8 = scalar_lea.hbm %s3647_s0, %s2521_s20  ;;  %s286_s9 = scalar_lea.vmem [#allocation6], %s3341_s30 }
  0x93   : > { %s294_s17 = sshll.u32 %s286_s9, 4  ;;  %p3351_p10 = pnand %p2719_p5, %p3312_p11  ;;  %s3355_s17 = int_to_ptr.vmem [resolvable:$true] %s294_s17 }
  0x94   : > { %s3360_s29 = scalar_lea.hbm %s3648_s1, %s2521_s20  ;;  %s283_s2 = scalar_lea.sflag [#allocation7], %s282_s19 }
  0x95   : > { %s2932_s3 = scalar_lea.hbm %s3346_s8, 128  ;;  %p2934_p1 = pneg %p3351_p10 }
  0x96   : > { %p2933_p8 = scmp.ne.s32.totalorder %s3346_s8, %s2932_s3  ;;  %s2937_s4 = scalar_lea.hbm %s3647_s0, 256 }
  0x97   : > { %p2938_p12 = scmp.lt.u32.totalorder %s3346_s8, %s3647_s0  ;;  %p2939_p6 = scmp.lt.u32.totalorder %s2937_s4, %s2932_s3 }
  0x98   : > { %p2935_p3 = pnand %p2934_p1, %p2933_p8  ;;  %p2941_p0 = scmp.lt.u32.totalorder %s2932_s3, %s3346_s8 }
  0x99   : > { %p2940_p13 = por %p2939_p6, %p2938_p12 }
  0x9a   : > { %p2936_p11 = pneg %p2935_p3 }
  0x9b   : > { %p2942_p7 = por %p2941_p0, %p2940_p13 }
  0x9d   : > { %p2943_p5 = pnand %p2942_p7, %p2936_p11 }
  0x9f   : > { %2946 = shalt.err (!%p2943_p5)
}
  0xa0   : > { %s2947_s19 = scalar_lea.vmem %s3355_s17, 128  ;;  %s3098_s20 = smov [#allocation6]  }
  0xa1   : > { %p2948_p8 = scmp.ne.s32.totalorder %s3355_s17, %s2947_s19  ;;  %s2952_s13 = sshll.u32 %s3098_s20, 4  ;;  %s2953_s13 = int_to_ptr.vmem [resolvable:$false] %s2952_s13 }
  0xa2   : > { %s2954_s5 = scalar_lea.vmem %s2953_s13, 256  ;;  %p2955_p4 = scmp.lt.s32.totalorder %s3355_s17, %s2953_s13 }
  0xa3   : > { %p2950_p3 = pnand %p2948_p8, %p2934_p1  ;;  %p2956_p12 = scmp.lt.s32.totalorder %s2954_s5, %s2947_s19 }
  0xa5   : > { %p2951_p9 = pneg %p2950_p3  ;;  %p2957_p6 = por %p2956_p12, %p2955_p4 }
  0xa7   : > { %p2958_p13 = pnand %p2957_p6, %p2951_p9 }
  0xa9   : > { %2961 = shalt.err (!%p2958_p13)
}
  0xaa   : > { %2707 = dma.hbm_to_vmem [thread:$0]  (!%p3351_p10), %s3346_s8, 128, %s3355_s17, %s283_s2  }
  0xab   : > { %s301_s3 = sand.u32 1, %s3090_s26   ;;  %s305_s4 = scalar_lea.vmem [#allocation9], %s3341_s30 }
  0xac   : > { %s313_s10 = sshll.u32 %s305_s4, 4  ;;  %s302_s11 = scalar_lea.sflag [#allocation10], %s301_s3  ;;  %s314_s10 = int_to_ptr.vmem [resolvable:$true] %s313_s10 }
  0xad   : > { %s2962_s12 = scalar_lea.hbm %s3360_s29, 128  ;;  %s2967_s20 = scalar_lea.hbm %s3648_s1, 256 }
  0xae   : > { %p2963_p4 = scmp.ne.s32.totalorder %s3360_s29, %s2962_s12  ;;  %p2968_p0 = scmp.lt.u32.totalorder %s3360_s29, %s3648_s1 }
  0xaf   : > { %p2969_p7 = scmp.lt.u32.totalorder %s2967_s20, %s2962_s12  ;;  %p2971_p8 = scmp.lt.u32.totalorder %s2962_s12, %s3360_s29 }
  0xb0   : > { %p2965_p9 = pnand %p2963_p4, %p2934_p1 }
  0xb1   : > { %p2970_p5 = por %p2969_p7, %p2968_p0 }
  0xb2   : > { %p2966_p11 = pneg %p2965_p9 }
  0xb3   : > { %p2972_p3 = por %p2971_p8, %p2970_p5 }
  0xb5   : > { %p2973_p12 = pnand %p2972_p3, %p2966_p11 }
  0xb7   : > { %2976 = shalt.err (!%p2973_p12)
}
  0xb8   : > { %s2977_s2 = scalar_lea.vmem %s314_s10, 128  ;;  %s3099_s30 = smov [#allocation9]  }
  0xb9   : > { %p2978_p6 = scmp.ne.s32.totalorder %s314_s10, %s2977_s2  ;;  %s2982_s8 = sshll.u32 %s3099_s30, 4  ;;  %s2983_s8 = int_to_ptr.vmem [resolvable:$false] %s2982_s8 }
  0xba   : > { %s2984_s17 = scalar_lea.vmem %s2983_s8, 256  ;;  %p2985_p9 = scmp.lt.s32.totalorder %s314_s10, %s2983_s8 }
  0xbb   : > { %p2980_p13 = pnand %p2978_p6, %p2934_p1  ;;  %p2986_p2 = scmp.lt.s32.totalorder %s2984_s17, %s2977_s2 }
  0xbd   : > { %p2981_p4 = pneg %p2980_p13  ;;  %p2987_p0 = por %p2986_p2, %p2985_p9 }
  0xbf   : > { %p2988_p7 = pnand %p2987_p0, %p2981_p4 }
  0xc1   : > { %2991 = shalt.err (!%p2988_p7)
}
  0xc2   : > { %2710 = dma.hbm_to_vmem [thread:$0]  (!%p3351_p10), %s3360_s29, 128, %s314_s10, %s302_s11  }
  0xc3   : > { %p3677_p11 = scmp.ne.s32.totalorder %s3663_s28, 0 }
  0xc4   : > { %s3411_s3 = sand.u32 (!%p3677_p11), 1, %s3074_s22   ;;  %p3678_p2 = scmp.ne.s32.totalorder (!%p3677_p11), %s3673_s14, 0 }
  0xc5   : > { %322 = sbr.rel (%p3677_p11) target bundleno = 1699 (0x6a3), region = 44  ;;  %s3414_s4 = sshll.u32 (!%p3677_p11), %s3411_s3, 3 }
  0xc6   : > { %s325_s12 = scalar_lea.sflag (!%p3677_p11), [#allocation7], %s3411_s3  ;;  %s328_s9 = scalar_lea.vmem (!%p3677_p11), [#allocation6], %s3414_s4 }
  0xcc   : > { %3045 = dma.done.wait (%p3678_p2), %s325_s12, 128  }
  0xcd   : > { %3047 = vsyncadd (%p3678_p2), %s325_s12, 4294967168  ;;  %s333_s28 = sand.u32 1, %s3182_s27   ;;  %s337_s29 = scalar_lea.vmem [#allocation9], %s3414_s4 }
  0xce   : > { %s334_s7 = scalar_lea.sflag [#allocation10], %s333_s28 }
  0xcf   : > { %3049 = dma.done.wait (%p3678_p2), %s334_s7, 128  }
  0xd0   : > { %3051 = vsyncadd (%p3678_p2), %s334_s7, 4294967168  ;;  %p3679_p10 = scmp.eq.s32.totalorder %s3182_s27, 0 }
  0xd2   : > { %3053 = dma.done.wait (%p3679_p10), [#allocation10], 256   ;;  %p3680_p1 = pmov %p3679_p10 }
  0xd4   : > { %3055 = vsyncadd (%p3680_p1), [#allocation10], 4294967040  ;;  %p3681_p5 = pmov %p3680_p1 }
  0xd5   : > { %p3682_p8 = pmov %p3680_p1 }
  0xd6   : > { %3057 = dma.done.wait (%p3681_p5), [#allocation13], 768  }
  0xd7   : > { %3059 = vsyncadd (%p3682_p8), [#allocation13], 4294966528  ;;  %p3683_p3 = pmov %p3680_p1 }
  0xd8   : > { %p3684_p12 = pmov %p3680_p1 }
  0xd9   : > { %3061 = dma.done.wait (%p3683_p3), [#allocation16], 16  }
  0xda   : > { %3063 = vsyncadd (%p3684_p12), [#allocation16], 4294967280  ;;  %v3100_v0 = vmov 0.0|0.0   ;;  %vm3101_vm0 = vmmov 0   ;;  %v3102_v1 = vmov 0.0   ;;  %v394_v2 = vld [vmem:[#allocation11] sm:$0xff]  ;;  %v568_v22 = vlaneseq }
  0xdb   : > { %2657 = vmatprep.subr.bf16.mxu1 %v3100_v0  ;;  %2596 = vmatprep.mubr.msk.f32.mxu1 %vm3101_vm0, %v3102_v1  ;;  %v395_v3 = vld [vmem:[#allocation11 + $0x8] sm:$0xff]  ;;  %v492_v5 = vld [vmem:[#allocation12] sm:$0xff]  ;;  %v493_v6 = vld [vmem:[#allocation12 + $0x8] sm:$0xff]  ;;  %vm396_vm1 = vcmask 130048   ;;  %vm471_vm2 = vcmask 261120   ;;  %vm578_vm3 = vcmask 64512  }
  0xdc   : > { %2606 = vmatprep.subr.mxu0 %v3102_v1  ;;  %2608 = vmatprep.mubr.msk.f32.mxu0 %vm3101_vm0, %v3102_v1  ;;  %v2658_v4 = vpack.c.bf16 %v395_v3, %v394_v2  ;;  %v393_v7 = vld [vmem:[%s328_s9] sm:$0xff]  ;;  %v2661_v8 = vpack.c.bf16 %v493_v6, %v492_v5  ;;  %v491_v9 = vld [vmem:[%s337_s29] sm:$0xff]  ;;  %482 = vst.msk [vmem:[#allocation5] sm:$0xff] %vm471_vm2, %v3102_v1  ;;  %s3103_s27 = smov 112   ;;  %s3104_s14 = smov 120   ;;  %v569_v23 = vshrl.u32 %v568_v22, 7 }
  0xdd   : > { %s3105_s10 = smov 104   ;;  %v573_v24 = vand.u32 127, %v568_v22  ;;  %vm473_vm4 = vcmask 7168   ;;  %v3106_v25 = vmov -inf   ;;  %v3107_v30 = vmov 0   ;;  %s3108_s11 = smov 96  }
  0xde   : > { %2659 = vmatpush3.bf16.msra.mxu1 %v2658_v4  ;;  %474 = vst.msk [vmem:[#allocation3] sm:$0xff] %vm473_vm4, %v3106_v25  ;;  %475 = vst.msk [vmem:[#allocation3 + $0x8] sm:$0xff] %vm473_vm4, %v3106_v25  ;;  %2794 = vset.pattern.permute.xlu1 %v3107_v30  ;;  %s3109_s19 = smov 88   ;;  %s3110_s20 = smov 80   ;;  %vm960_vm6 = vcmask 130112   ;;  %vm1157_vm7 = vcmask 195712  }
  0xdf   : > { %2660 = vmatprep.subr.bf16.mxu1 %v3100_v0  ;;  %vm576_vm5 = vcmp.gt.s32.totalorder %v573_v24, %v569_v23  ;;  %476 = vst.msk [vmem:[#allocation3 + $0x10] sm:$0xff] %vm473_vm4, %v3106_v25  ;;  %477 = vst.msk [vmem:[#allocation3 + $0x18] sm:$0xff] %vm473_vm4, %v3106_v25  ;;  %2795 = vset.pattern.permute.xlu0 %v3107_v30  ;;  %s3111_s13 = smov 72   ;;  %s3112_s5 = smov 8   ;;  %vm1354_vm8 = vcmask 261312  }
  0xe0   : > { %478 = vst.msk [vmem:[#allocation4] sm:$0xff] %vm473_vm4, %v3102_v1  ;;  %479 = vst.msk [vmem:[#allocation4 + $0x8] sm:$0xff] %vm473_vm4, %v3102_v1  ;;  %s3113_s2 = smov 16   ;;  %s3114_s30 = smov 24  }
  0xe1   : > { %2597 = vmatmul.mubr.msk.f32.vlgmr.msra.gmra.mrb[0].mxu1 %vm396_vm1, %v393_v7  ;;  %480 = vst.msk [vmem:[#allocation4 + $0x10] sm:$0xff] %vm473_vm4, %v3102_v1  ;;  %481 = vst.msk [vmem:[#allocation4 + $0x18] sm:$0xff] %vm473_vm4, %v3102_v1  ;;  %s2562_s8 = sshll.u32 %s3082_s24, 7  ;;  %s386_s17 = scalar_lea.vmem [#allocation17], %s3414_s4 }
  0xe2   : > { %2662 = vmatpush3.bf16.msra.mxu1 %v2661_v8  ;;  %2603 = vmatprep.mubr.msk.f32.mxu1 %vm3101_vm0, %v3102_v1  ;;  %s2367_s12 = sshll.u32 %s386_s17, 4  ;;  %s3597_s7 = scalar_lea.hbm %s3653_s6, %s2562_s8  ;;  %s3599_s12 = int_to_ptr.vmem [resolvable:$true] %s2367_s12 }
  0xe3   : > { %2611 = vmatprep.subr.mxu1 %v3102_v1  ;;  %s2353_s29 = scalar_lea.sflag [#allocation8], %s3411_s3  ;;  %p3685_p13 = scmp.ne.s32.totalorder %s3674_s15, 0 }
  0xe4   : > { %s3115_s24 = smov [#allocation17]  }
  0xe5   : > { %2604 = vmatmul.mubr.msk.f32.vlgmr.msra.gmra.mrb[2].mxu1 %vm396_vm1, %v491_v9  ;;  %v3504_v43 = vld [vmem:[#allocation3] sm:$0xff]  ;;  %v3514_v47 = vld [vmem:[#allocation3 + $0x8] sm:$0xff]  ;;  %s2996_s4 = sshll.u32 %s3115_s24, 4  ;;  %s2997_s4 = int_to_ptr.vmem [resolvable:$false] %s2996_s4 }
  0xe6   : > { %2613 = vmatprep.mubr.msk.f32.mxu1 %vm3101_vm0, %v3102_v1  ;;  %v3519_v50 = vld [vmem:[#allocation3 + $0x10] sm:$0xff]  ;;  %v3529_v54 = vld [vmem:[#allocation3 + $0x18] sm:$0xff]  ;;  %p2999_p0 = scmp.lt.s32.totalorder %s3599_s12, %s2997_s4 }
  0xe7   : > { %v672_v25 = vld [vmem:[#allocation4] sm:$0xff] }
 0x1b4   : > { %v466_v10 = vpop.f32.mrb[0].mxu1 }
 0x1b5   : > { %v470_v11 = vmul.f32 0.35355338, %v466_v10  ;;  %v2598_v12 = vpop.f32.mrb[1].mxu1 }
 0x1b7   : > { %472 = vst.msk [vmem:[#allocation2] sm:$0xff] %vm471_vm2, %v470_v11 }
 0x1b8   : > { %v3455_v13 = vpop.f32.mrb[2].mxu1 }
 0x1b9   : > { %v2605_v14 = vpop.f32.mrb[3].mxu1  ;;  %967 = vrot.lane.b32.xlu1 %v3455_v13, %s3103_s27  ;;  %770 = vrot.lane.b32.xlu0 %v3455_v13, %s3104_s14 }
 0x1ba   : > { %2607 = vmatpush3.xpose.msk.msra.mxu0 %vm578_vm3, %v3455_v13 }
 0x1bb   : > { %2616 = vmatprep.subr.mxu0 %v3102_v1 }
 0x1be   : > { %v963_v15 = vld [vmem:[#allocation2] sm:$0xff] }
 0x1bf   : > { %965 = vrot.lane.b32.xlu1 %v963_v15, %s3103_s27  ;;  %768 = vrot.lane.b32.xlu0 %v963_v15, %s3104_s14  ;;  %s2992_s27 = scalar_lea.vmem %s3599_s12, 128  ;;  %s2998_s14 = scalar_lea.vmem %s2997_s4, 256 }
 0x1c0   : > { %2609 = vmatmul.mubr.msk.f32.vlgmr.msra.gmra.mrb[0].mxu0 %vm578_vm3, %v963_v15  ;;  %p2993_p6 = scmp.ne.s32.totalorder %s3599_s12, %s2992_s27  ;;  %p3000_p7 = scmp.lt.s32.totalorder %s2998_s14, %s2992_s27 }
 0x1c1   : > { %2618 = vmatprep.mubr.msk.f32.mxu0 %vm3101_vm0, %v3102_v1 }
 0x1c2   : > { %p2994_p4 = pnand %p2993_p6, %p3685_p13  ;;  %p3001_p11 = por %p3000_p7, %p2999_p0 }
 0x1c3   : > { %1162 = vrot.lane.b32.xlu1 %v963_v15, %s3105_s10  ;;  %1164 = vrot.lane.b32.xlu0 %v3455_v13, %s3105_s10 }
 0x1c4   : > { %p2995_p9 = pneg %p2994_p4 }
 0x1c6   : > { %p3002_p2 = pnand %p3001_p11, %p2995_p9 }
 0x22b   : > { %v771_v16 = vpop.permute.xlu0 %770  ;;  %v968_v17 = vpop.permute.xlu1 %967 }
 0x22c   : > { %2617 = vmatpush3.xpose.msk.msra.mxu0 %vm578_vm3, %v771_v16 }
 0x22d   : > { %2626 = vmatprep.subr.mxu0 %v3102_v1 }
 0x231   : > { %v769_v18 = vpop.permute.xlu0 %768  ;;  %v966_v19 = vpop.permute.xlu1 %965 }
 0x232   : > { %2619 = vmatmul.mubr.msk.f32.vlgmr.msra.gmra.mrb[2].mxu0 %vm578_vm3, %v769_v18 }
 0x233   : > { %2627 = vmatpush3.xpose.msk.msra.mxu0 %vm578_vm3, %v968_v17  ;;  %2628 = vmatprep.mubr.msk.f32.mxu0 %vm3101_vm0, %v3102_v1 }
 0x234   : > { %2636 = vmatprep.subr.mxu0 %v3102_v1 }
 0x235   : > { %v1165_v20 = vpop.permute.xlu0 %1164  ;;  %v1163_v21 = vpop.permute.xlu1 %1162 }
 0x236   : > { %2629 = vmatmul.mubr.msk.f32.vlgmr.msra.gmra.mrb[4].mxu0 %vm578_vm3, %v966_v19 }
 0x237   : > { %2637 = vmatpush3.xpose.msk.msra.mxu0 %vm578_vm3, %v1165_v20  ;;  %2638 = vmatprep.mubr.msk.f32.mxu0 %vm3101_vm0, %v3102_v1 }
 0x238   : > { %2663 = vmatprep.subr.bf16.mxu0 %v3100_v0 }
 0x23a   : > { %2639 = vmatmul.mubr.msk.f32.vlgmr.msra.gmra.mrb[6].mxu0 %vm578_vm3, %v1163_v21 }
 0x23b   : > { %2654 = vmatprep.mubr.msk.f32.mxu0 %vm3101_vm0, %v3102_v1 }
 0x293   : > { %v651_v26 = vpop.f32.mrb[0].mxu0 }
 0x294   : > { %v655_v27 = vsel %vm576_vm5, -2.3819763e+38, %v651_v26  ;;  %v2610_v28 = vpop.f32.mrb[1].mxu0 }
 0x295   : > { %v657_v29 = vsel %vm578_vm3, %v655_v27, -inf }
 0x296   : > { %658 = vmax.xlane.f32.xlu0 %v657_v29  ;;  %v865_v29 = vld [vmem:[#allocation4 + $0x8] sm:$0xff] }
 0x305   : > { %v842_v31 = vpop.f32.mrb[2].mxu0 }
 0x306   : > { %v846_v32 = vsel %vm576_vm5, -2.3819763e+38, %v842_v31  ;;  %v2620_v33 = vpop.f32.mrb[3].mxu0 }
 0x307   : > { %v849_v34 = vsel %vm578_vm3, %v846_v32, -inf }
 0x308   : > { %850 = vmax.xlane.f32.xlu1 %v849_v34  ;;  %v1062_v34 = vld [vmem:[#allocation4 + $0x10] sm:$0xff] }
 0x309   : > { %v1039_v35 = vpop.f32.mrb[4].mxu0 }
 0x30a   : > { %v1043_v36 = vsel %vm576_vm5, -2.3819763e+38, %v1039_v35  ;;  %v2630_v37 = vpop.f32.mrb[5].mxu0 }
 0x30b   : > { %v1046_v38 = vsel %vm578_vm3, %v1043_v36, -inf }
 0x30c   : > { %1047 = vmax.xlane.f32.xlu0 %v1046_v38 }
 0x30d   : > { %v1236_v39 = vpop.f32.mrb[6].mxu0 }
 0x30e   : > { %v3500_v40 = vsel %vm576_vm5, -2.3819763e+38, %v1236_v39  ;;  %v2640_v41 = vpop.f32.mrb[7].mxu0 }
 0x30f   : > { %v1243_v42 = vsel %vm578_vm3, %v3500_v40, -inf }
 0x310   : > { %1244 = vmax.xlane.f32.xlu0 %v1243_v42 }
 0x323   : > { %v659_v44 = vpop.xlane.xlu0 %658 }
 0x324   : > { %v3507_v45 = vmax.f32 %v3504_v43, %v659_v44  ;;  %v680_v44 = vld [vmem:[#allocation5] sm:$0xff] }
 0x326   : > { %v661_v46 = vsub.f32 %v3504_v43, %v3507_v45  ;;  %765 = vst.msk [vmem:[#allocation3] sm:$0xff] %vm473_vm4, %v3507_v45  ;;  %666 = vperm.xlu1 %2794, %v3507_v45  }
 0x328   : > { %v662_v18 = vmul.f32 1.442695, %v661_v46 }
 0x395   : > { %v851_v48 = vpop.xlane.xlu1 %850 }
 0x396   : > { %v3517_v49 = vmax.f32 %v3514_v47, %v851_v48 }
 0x398   : > { %v853_v51 = vsub.f32 %v3514_v47, %v3517_v49  ;;  %962 = vst.msk [vmem:[#allocation3 + $0x8] sm:$0xff] %vm473_vm4, %v3517_v49  ;;  %858 = vperm.xlu0 %2795, %v3517_v49  }
 0x399   : > { %v1048_v52 = vpop.xlane.xlu0 %1047 }
 0x39a   : > { %v3527_v53 = vmax.f32 %v3519_v50, %v1048_v52  ;;  %v854_v23 = vmul.f32 1.442695, %v853_v51 }
 0x39c   : > { %v1050_v55 = vsub.f32 %v3519_v50, %v3527_v53  ;;  %1159 = vst.msk [vmem:[#allocation3 + $0x10] sm:$0xff] %vm473_vm4, %v3527_v53  ;;  %1055 = vperm.xlu1 %2794, %v3527_v53  }
 0x39d   : > { %v1245_v56 = vpop.xlane.xlu0 %1244 }
 0x39e   : > { %v3537_v57 = vmax.f32 %v3529_v54, %v1245_v56  ;;  %v1051_v28 = vmul.f32 1.442695, %v1050_v55 }
 0x3a0   : > { %v1247_v58 = vsub.f32 %v3529_v54, %v3537_v57  ;;  %1356 = vst.msk [vmem:[#allocation3 + $0x18] sm:$0xff] %vm473_vm4, %v3537_v57  ;;  %687 = vrot.lane.b32.xlu1 %v3455_v13, %s3108_s11 }
 0x3a2   : > { %v1248_v30 = vmul.f32 1.442695, %v1247_v58 }
 0x3a4   : > { %879 = vrot.lane.b32.xlu1 %v3455_v13, %s3109_s19 }
 0x3a5   : > { %v667_v59 = vpop.permute.xlu1 %666 }
 0x3a6   : > { %v669_v60 = vsub.f32 %v655_v27, %v667_v59 }
 0x3a8   : > { %1252 = vperm.xlu1 %2794, %v3537_v57   ;;  %v670_v61 = vmul.f32 1.442695, %v669_v60 }
 0x3aa   : > { %2796 = vpow2.f32 %v670_v61 }
 0x3ac   : > { %1076 = vrot.lane.b32.xlu1 %v3455_v13, %s3110_s20 }
 0x3b0   : > { %1273 = vrot.lane.b32.xlu1 %v3455_v13, %s3111_s13 }
 0x3b4   : > { %v2797_v62 = vpop.eup %2796 }
 0x3b5   : > { %v674_v63 = vsel %vm578_vm3, %v2797_v62, 0.0 }
 0x3d4   : > { %675 = vadd.xlane.f32.xlu1 %v674_v63 }
 0x417   : > { %v859_v2 = vpop.permute.xlu0 %858 }
 0x418   : > { %v861_v3 = vsub.f32 %v846_v32, %v859_v2  ;;  %v2266_v2 = vld [vmem:[#allocation14] sm:$0xff] }
 0x41a   : > { %v862_v4 = vmul.f32 1.442695, %v861_v3  ;;  %v2267_v3 = vld [vmem:[#allocation14 + $0x8] sm:$0xff] }
 0x41b   : > { %v1056_v5 = vpop.permute.xlu1 %1055 }
 0x41c   : > { %2798 = vpow2.f32 %v862_v4  ;;  %v1058_v6 = vsub.f32 %v1043_v36, %v1056_v5  ;;  %v2664_v4 = vpack.c.bf16 %v2267_v3, %v2266_v2  ;;  %v2268_v5 = vld [vmem:[#allocation14 + $0x10] sm:$0xff] }
 0x41e   : > { %v1059_v7 = vmul.f32 1.442695, %v1058_v6  ;;  %v2269_v6 = vld [vmem:[#allocation14 + $0x18] sm:$0xff]  ;;  %2665 = vmatpush3.bf16.msra.mxu0 %v2664_v4 }
 0x41f   : > { %v688_v8 = vpop.permute.xlu1 %687  ;;  %2666 = vmatprep.subr.bf16.mxu0 %v3100_v0 }
 0x420   : > { %2800 = vpow2.f32 %v1059_v7  ;;  %2612 = vmatpush3.msra.mxu1 %v688_v8  ;;  %v2667_v7 = vpack.c.bf16 %v2269_v6, %v2268_v5 }
 0x421   : > { %2614 = vmatmul.mubr.msk.f32.vlgmr.msra.gmra.mrb[4].mxu1 %vm578_vm3, %v2797_v62  ;;  %2621 = vmatprep.subr.mxu1 %v3102_v1 }
 0x422   : > { %2623 = vmatprep.mubr.msk.f32.mxu1 %vm3101_vm0, %v3102_v1  ;;  %2668 = vmatpush3.bf16.msra.mxu0 %v2667_v7 }
 0x423   : > { %v880_v9 = vpop.permute.xlu1 %879 }
 0x424   : > { %2622 = vmatpush3.msra.mxu1 %v880_v9 }
 0x425   : > { %2631 = vmatprep.subr.mxu1 %v3102_v1 }
 0x426   : > { %v2799_v10 = vpop.eup %2798 }
 0x427   : > { %v1253_v11 = vpop.permute.xlu1 %1252  ;;  %2624 = vmatmul.mubr.msk.f32.vlgmr.msra.gmra.mrb[6].mxu1 %vm578_vm3, %v2799_v10  ;;  %v867_v12 = vsel %vm578_vm3, %v2799_v10, 0.0 }
 0x428   : > { %v1255_v13 = vsub.f32 %v3500_v40, %v1253_v11  ;;  %868 = vadd.xlane.f32.xlu0 %v867_v12  ;;  %2633 = vmatprep.mubr.msk.f32.mxu1 %vm3101_vm0, %v3102_v1  ;;  %v1259_v40 = vld [vmem:[#allocation4 + $0x18] sm:$0xff] }
 0x42a   : > { %v2801_v14 = vpop.eup %2800  ;;  %v1256_v15 = vmul.f32 1.442695, %v1255_v13 }
 0x42b   : > { %v1077_v16 = vpop.permute.xlu1 %1076  ;;  %v1064_v17 = vsel %vm578_vm3, %v2801_v14, 0.0 }
 0x42c   : > { %2802 = vpow2.f32 %v1256_v15  ;;  %1065 = vadd.xlane.f32.xlu1 %v1064_v17  ;;  %2632 = vmatpush3.msra.mxu1 %v1077_v16 }
 0x42d   : > { %2634 = vmatmul.mubr.msk.f32.vlgmr.msra.gmra.mrb[8].mxu1 %vm578_vm3, %v2801_v14  ;;  %2641 = vmatprep.subr.mxu1 %v3102_v1  ;;  %2804 = vpow2.f32 %v662_v18 }
 0x42e   : > { %2643 = vmatprep.mubr.msk.f32.mxu1 %vm3101_vm0, %v3102_v1  ;;  %2806 = vpow2.f32 %v854_v23 }
 0x42f   : > { %v1274_v19 = vpop.permute.xlu1 %1273  ;;  %2808 = vpow2.f32 %v1051_v28 }
 0x430   : > { %2642 = vmatpush3.msra.mxu1 %v1274_v19  ;;  %2810 = vpow2.f32 %v1248_v30 }
 0x436   : > { %v2803_v20 = vpop.eup %2802 }
 0x437   : > { %2644 = vmatmul.mubr.msk.f32.vlgmr.msra.gmra.mrb[10].mxu1 %vm578_vm3, %v2803_v20  ;;  %v1261_v21 = vsel %vm578_vm3, %v2803_v20, 0.0  ;;  %v2805_v22 = vpop.eup %2804 }
 0x438   : > { %1262 = vadd.xlane.f32.xlu0 %v1261_v21  ;;  %v2807_v24 = vpop.eup %2806  ;;  %v673_v1 = vmul.f32 %v2805_v22, %v672_v25 }
 0x439   : > { %v866_v31 = vmul.f32 %v2807_v24, %v865_v29  ;;  %v2809_v32 = vpop.eup %2808 }
 0x43a   : > { %v1063_v36 = vmul.f32 %v2809_v32, %v1062_v34  ;;  %v2811_v39 = vpop.eup %2810  ;;  %v2559_v34 = vld [vmem:[#allocation15] ss:$0 sm:$0xff] }
 0x43b   : > { %v1260_v41 = vmul.f32 %v2811_v39, %v1259_v40 }
 0x43d   : > { %683 = vperm.xlu1 %2794, %v2805_v22  }
 0x44e   : > { %875 = vperm.xlu0 %2795, %v2807_v24  }
 0x461   : > { %v676_v26 = vpop.xlane.xlu1 %675 }
 0x462   : > { %v677_v27 = vadd.f32 %v676_v26, %v673_v1 }
 0x464   : > { %679 = vst.msk [vmem:[#allocation4] sm:$0xff] %vm473_vm4, %v677_v27 }
 0x46b   : > { %v2219_v50 = vld [vmem:[#allocation4] sm:$0xff] }
 0x46c   : > { %2812 = vrcp.f32 %v2219_v50 }
 0x476   : > { %v2813_v58 = vpop.eup %2812 }
 0x4b5   : > { %v869_v33 = vpop.xlane.xlu0 %868 }
 0x4b6   : > { %v870_v35 = vadd.f32 %v869_v33, %v866_v31 }
 0x4b8   : > { %871 = vst.msk [vmem:[#allocation4 + $0x8] sm:$0xff] %vm473_vm4, %v870_v35 }
 0x4b9   : > { %v1066_v37 = vpop.xlane.xlu1 %1065 }
 0x4ba   : > { %v1067_v38 = vadd.f32 %v1066_v37, %v1063_v36 }
 0x4bc   : > { %1068 = vst.msk [vmem:[#allocation4 + $0x10] sm:$0xff] %vm473_vm4, %v1067_v38 }
 0x4bd   : > { %v684_v45 = vpop.permute.xlu1 %683 }
 0x4be   : > { %v686_v46 = vmul.f32 %v684_v45, %v680_v44 }
 0x4bf   : > { %v2231_v56 = vld [vmem:[#allocation4 + $0x8] sm:$0xff] }
 0x4c3   : > { %v2243_v53 = vld [vmem:[#allocation4 + $0x10] sm:$0xff] }
 0x4c4   : > { %2814 = vrcp.f32 %v2243_v53 }
 0x4c5   : > { %v1263_v42 = vpop.xlane.xlu0 %1262  ;;  %2816 = vrcp.f32 %v2231_v56 }
 0x4c6   : > { %v1264_v43 = vadd.f32 %v1263_v42, %v1260_v41 }
 0x4c8   : > { %1265 = vst.msk [vmem:[#allocation4 + $0x18] sm:$0xff] %vm473_vm4, %v1264_v43 }
 0x4cd   : > { %v876_v9 = vpop.permute.xlu0 %875 }
 0x4ce   : > { %v2815_v59 = vpop.eup %2814 }
 0x4cf   : > { %v2255_v57 = vld [vmem:[#allocation4 + $0x18] sm:$0xff]  ;;  %v2817_v62 = vpop.eup %2816 }
 0x4d0   : > { %2818 = vrcp.f32 %v2255_v57 }
 0x4da   : > { %v2819_v63 = vpop.eup %2818 }
 0x4f4   : > { %v759_v47 = vpop.f32.mrb[4].mxu1 }
 0x4f5   : > { %v763_v48 = vadd.f32 %v759_v47, %v686_v46  ;;  %v2615_v49 = vpop.f32.mrb[5].mxu1 }
 0x4f7   : > { %764 = vst.msk [vmem:[#allocation5] sm:$0xff] %vm578_vm3, %v763_v48 }
 0x4fa   : > { %v951_v51 = vpop.f32.mrb[6].mxu1 }
 0x4fb   : > { %956 = vrot.lane.b32.xlu1 %v951_v51, %s3112_s5  ;;  %v2625_v52 = vpop.f32.mrb[7].mxu1 }
 0x4fe   : > { %v872_v8 = vld [vmem:[#allocation5] sm:$0xff] }
 0x4ff   : > { %1072 = vperm.xlu1 %2794, %v2809_v32   ;;  %v878_v10 = vmul.f32 %v876_v9, %v872_v8 }
 0x500   : > { %v1148_v54 = vpop.f32.mrb[8].mxu1 }
 0x501   : > { %1153 = vrot.lane.b32.xlu0 %v1148_v54, %s3113_s2  ;;  %v2635_v55 = vpop.f32.mrb[9].mxu1 }
 0x503   : > { %1269 = vperm.xlu1 %2794, %v2811_v39  }
 0x507   : > { %2223 = vperm.xlu1 %2794, %v2813_v58  }
 0x50a   : > { %v1345_v60 = vpop.f32.mrb[10].mxu1 }
 0x50b   : > { %2247 = vperm.xlu1 %2794, %v2815_v59   ;;  %1350 = vrot.lane.b32.xlu0 %v1345_v60, %s3114_s30  ;;  %v2645_v61 = vpop.f32.mrb[11].mxu1 }
 0x50f   : > { %2235 = vperm.xlu0 %2795, %v2817_v62  }
 0x513   : > { %2259 = vperm.xlu0 %2795, %v2819_v63  }
 0x56d   : > { %v957_v11 = vpop.permute.xlu1 %956 }
 0x56e   : > { %v959_v12 = vadd.f32 %v957_v11, %v878_v10 }
 0x570   : > { %961 = vst.msk [vmem:[#allocation5] sm:$0xff] %vm960_vm6, %v959_v12 }
 0x573   : > { %v1154_v16 = vpop.permute.xlu0 %1153 }
 0x577   : > { %v1069_v13 = vld [vmem:[#allocation5] sm:$0xff] }
 0x57d   : > { %v1351_v20 = vpop.permute.xlu0 %1350 }
 0x57e   : > { %v1073_v14 = vpop.permute.xlu1 %1072 }
 0x57f   : > { %v1075_v15 = vmul.f32 %v1073_v14, %v1069_v13 }
 0x581   : > { %v1156_v17 = vadd.f32 %v1154_v16, %v1075_v15 }
 0x582   : > { %v1270_v18 = vpop.permute.xlu1 %1269 }
 0x583   : > { %1158 = vst.msk [vmem:[#allocation5] sm:$0xff] %vm1157_vm7, %v1156_v17 }
 0x586   : > { %v2224_v22 = vpop.permute.xlu1 %2223 }
 0x58a   : > { %v1266_v19 = vld [vmem:[#allocation5] sm:$0xff]  ;;  %v2248_v27 = vpop.permute.xlu1 %2247 }
 0x58b   : > { %v1272_v0 = vmul.f32 %v1270_v18, %v1266_v19 }
 0x58d   : > { %v1353_v21 = vadd.f32 %v1351_v20, %v1272_v0 }
 0x58e   : > { %v2236_v1 = vpop.permute.xlu0 %2235 }
 0x58f   : > { %1355 = vst.msk [vmem:[#allocation5] sm:$0xff] %vm1354_vm8, %v1353_v21 }
 0x592   : > { %v2260_v31 = vpop.permute.xlu0 %2259 }
 0x596   : > { %v2218_v23 = vld [vmem:[#allocation5] sm:$0xff] }
 0x597   : > { %v2226_v24 = vmul.f32 %v2224_v22, %v2218_v23 }
 0x599   : > { %2228 = vst.msk [vmem:[#allocation5] sm:$0xff] %vm578_vm3, %v2226_v24 }
 0x5a0   : > { %v2229_v25 = vld [vmem:[#allocation5] sm:$0xff] }
 0x5a1   : > { %v2238_v26 = vmul.f32 %v2236_v1, %v2229_v25 }
 0x5a3   : > { %2240 = vst.msk [vmem:[#allocation5] sm:$0xff] %vm960_vm6, %v2238_v26 }
 0x5aa   : > { %v2241_v28 = vld [vmem:[#allocation5] sm:$0xff] }
 0x5ab   : > { %v2250_v29 = vmul.f32 %v2248_v27, %v2241_v28 }
 0x5ad   : > { %2252 = vst.msk [vmem:[#allocation5] sm:$0xff] %vm1157_vm7, %v2250_v29 }
 0x5b4   : > { %v2253_v30 = vld [vmem:[#allocation5] sm:$0xff] }
 0x5b5   : > { %v2262_v32 = vmul.f32 %v2260_v31, %v2253_v30 }
 0x5b7   : > { %2264 = vst.msk [vmem:[#allocation5] sm:$0xff] %vm1354_vm8, %v2262_v32 }
 0x5be   : > { %v2265_v33 = vld [vmem:[#allocation5] sm:$0xff] }
 0x5bf   : > { %2655 = vmatmul.mubr.msk.f32.vlgmr.msra.gmra.mrb[8].mxu0 %vm471_vm2, %v2265_v33 }
 0x692   : > { %v2347_v35 = vpop.f32.mrb[8].mxu0 }
 0x693   : > { %v2348_v36 = vadd.f32 %v2559_v34, %v2347_v35  ;;  %v2656_v37 = vpop.f32.mrb[9].mxu0 }
 0x695   : > { %2351 = vst.msk [vmem:[%s386_s17] sm:$0xff] %vm471_vm2, %v2348_v36 }
 0x696   : > { %3005 = shalt.err (!%p3002_p2)
}
 0x697   : > { %s3006_s3 = scalar_lea.hbm %s3597_s7, 128  ;;  %s3010_s19 = scalar_lea.hbm %s3653_s6, 256 }
 0x698   : > { %p3007_p10 = scmp.ne.s32.totalorder %s3597_s7, %s3006_s3  ;;  %p3011_p8 = scmp.lt.u32.totalorder %s3597_s7, %s3653_s6 }
 0x699   : > { %p3012_p3 = scmp.lt.u32.totalorder %s3010_s19, %s3006_s3  ;;  %p3014_p6 = scmp.lt.u32.totalorder %s3006_s3, %s3597_s7 }
 0x69a   : > { %p3008_p1 = pnand %p3007_p10, %p3685_p13 }
 0x69b   : > { %p3013_p12 = por %p3012_p3, %p3011_p8 }
 0x69c   : > { %p3009_p5 = pneg %p3008_p1 }
 0x69d   : > { %p3015_p4 = por %p3014_p6, %p3013_p12 }
 0x69f   : > { %p3016_p9 = pnand %p3015_p4, %p3009_p5 }
 0x6a1   : > { %3019 = shalt.err (!%p3016_p9)
}
 0x6a2   : > { %2689 = dma.vmem_to_hbm [thread:$0]  (%p3685_p13), %s3599_s12, 128, %s3597_s7, %s2353_s29  }
 0x6a3 PF: > { %s2379_s5 = sand.u32 1, %s3070_s21   ;;  %p3686_p0 = scmp.ne.s32.totalorder %s3675_s18, 0 }
 0x6a4   : > { %p3687_p7 = scmp.ge.s32.totalorder %s3090_s26, 2  ;;  %s2380_s2 = scalar_lea.sflag [#allocation8], %s2379_s5 }
 0x6a6   : > { %p2712_p11 = pnand %p3687_p7, %p3686_p0 }
 0x6a8   : > { %3065 = dma.done.wait (!%p2712_p11), %s2380_s2, 128  }
 0x6a9   : > { %3067 = vsyncadd (!%p2712_p11), %s2380_s2, 4294967168  ;;  %s27_s26 = sadd.s32 1, %s3090_s26   ;;  %s3688_s15 = sld [smem:[#allocation24_spill]] }
 0x6aa   : > { %p24_p2 = scmp.ge.s32.totalorder %s27_s26, 4   ;;  %s3689_s21 = smov %s3074_s22 }
 0x6ab   : > { %s3690_s22 = smov %s3078_s23  ;;  %s3691_s23 = smov %s3332_s16 }
 0x6ac   : > { %s3692_s24 = smov %s3086_s25  ;;  %26 = sbr.rel (!%p24_p2) target bundleno = 15 (0xf), region = 149 }
 0x6af   : > { %s3693_s25 = smov %s3688_s15 }
 0x6b3   :  { %2385 = vsyncpa [#allocation7], 1 }
 0x6b4   :  { %2387 = vsyncpa [#allocation7 + $0x1], 1 }
 0x6b5   :  { %2388 = vsyncpa [#allocation10], 1 }
 0x6b6   :  { %2390 = vsyncpa [#allocation10 + $0x1], 1 }
 0x6b7   :  { %2391 = vsyncpa [#allocation13], 1 }
 0x6b8   :  { %2392 = vsyncpa [#allocation16], 1 }
 0x6b9   :  { %2393 = vsyncpa [#allocation8], 1 }
 0x6ba   :  { %2395 = vsyncpa [#allocation8 + $0x1], 1 }

</bundles_post_ra>
